<compile_context>
chip_gen: v6e
topology: v6e:2x2x1
jax: 0.10.0
libtpu: 0.0.40
codegen_flags: <defaults>
</compile_context>

<pallas_src>
import numpy as np
import jax
import jax.numpy as jnp
from jax.experimental import pallas as pl
from jax.experimental.pallas import tpu as pltpu

INPUT_DIM = 28               # fixed by fc1 = Linear(32 * 13, 64)
CONV_OUT = INPUT_DIM - 2     # 26
POOL_OUT = CONV_OUT // 2     # 13
N_CH = 32
N_FEAT = N_CH * POOL_OUT     # 416 (PyTorch flatten size)
PAD_F = 512                  # features padded to a lane-aligned K
H1 = 64
N_OUT = 10
PAD_OUT = 128                # lane-dense padded output width (sliced to 10 in wrapper)
MAX_BLOCK_B = 1024           # fits comfortably under v5e/v6e/v7x scoped VMEM defaults
MEGACORE_SPLIT = 256         # above this, split batch into >=2 grid steps (v7x megacore)


def _round_up(x, m):
    return ((x + m - 1) // m) * m


def cnn_kernel(x_ref, we_ref, wo_ref, wc_ref, bc_ref, out_ref):
    # x_ref   : (BLK, 28)    raw input rows (lane-dense)
    # we_ref  : (28, 512)    conv-as-matmul weights, even conv positions
    # wo_ref  : (28, 512)    conv-as-matmul weights, odd conv positions
    #                        (feature index within each = c*13 + l, PyTorch flatten)
    # wc_ref  : (512, 128)   folded fc1@fc2 weight, rows>=416 and cols>=10 are zero
    # bc_ref  : (1, 128)     folded bias: conv_bias@Wc + fc1_b@fc2_w.T + fc2_b
    # out_ref : (BLK, 128)   lane-dense output, cols [0,10) are the real logits
    hp = jax.lax.Precision.HIGHEST
    x = x_ref[...]

    # Conv1d(1,32,k=3): even/odd output positions as two MXU matmuls; MaxPool1d(2,2)
    # is then an elementwise max (conv bias is folded into bc, exact post-max add).
    conv_e = jnp.dot(x, we_ref[...], preferred_element_type=jnp.float32, precision=hp)
    conv_o = jnp.dot(x, wo_ref[...], preferred_element_type=jnp.float32, precision=hp)
    pooled = jnp.maximum(conv_e, conv_o)                                   # (BLK, 512)

    # Folded fc1 @ fc2 in a single K=512 contraction + folded bias.
    out = jnp.dot(pooled, wc_ref[...],
                  preferred_element_type=jnp.float32, precision=hp) + bc_ref[...]
    out_ref[...] = out.astype(out_ref.dtype)


def _build_conv_matrices(conv_w, conv_b):
    """Fold Conv1d(1,32,k=3) + MaxPool layout + channel-major flatten into dense
    matmul weights (even/odd halves).  Layout-only parameter preprocessing."""
    w_ck = conv_w[:, 0, :].astype(jnp.float32)            # (32, 3)
    j = jnp.arange(INPUT_DIM)[:, None]                    # (28, 1)   input position
    f = jnp.arange(PAD_F)[None, :]                        # (1, 512)  flattened feature
    c = jnp.clip(f // POOL_OUT, 0, N_CH - 1)              # channel of feature f
    l = f % POOL_OUT                                      # pooled position of feature f
    valid_f = f < N_FEAT

    def half(k):                                          # k = tap index (j - conv_pos)
        ok = valid_f & (k >= 0) & (k < 3)
        return jnp.where(ok, w_ck[c, jnp.clip(k, 0, 2)], 0.0)   # (28, 512)

    w_even = half(j - 2 * l)                              # conv position 2l
    w_odd = half(j - (2 * l + 1))                         # conv position 2l + 1
    bias = jnp.concatenate(
        [jnp.repeat(conv_b.astype(jnp.float32), POOL_OUT),
         jnp.zeros((PAD_F - N_FEAT,), jnp.float32)])[None, :]   # (1, 512)
    return w_even, w_odd, bias


def _fold_params(params):
    """Build kernel-side weights: conv-as-matmul halves + folded fc1*fc2 + bias."""
    conv_w, conv_b, fc1_w, fc1_b, fc2_w, fc2_b = params
    w_even, w_odd, bconv = _build_conv_matrices(conv_w, conv_b)

    w1p = jnp.concatenate(
        [jnp.transpose(fc1_w).astype(jnp.float32),
         jnp.zeros((PAD_F - N_FEAT, H1), jnp.float32)], axis=0)   # (512, 64)
    w2t = jnp.transpose(fc2_w).astype(jnp.float32)                # (64, 10)

    wc = jnp.dot(w1p, w2t, precision='highest')                   # (512, 10)
    bc = (jnp.dot(bconv, wc, precision='highest')
          + jnp.dot(fc1_b.astype(jnp.float32)[None, :], w2t, precision='highest')
          + fc2_b.astype(jnp.float32)[None, :])                   # (1, 10)

    # Lane-dense padding of the output dimension (10 -> 128).
    wc = jnp.pad(wc, ((0, 0), (0, PAD_OUT - N_OUT)))
    bc = jnp.pad(bc, ((0, 0), (0, PAD_OUT - N_OUT)))
    return w_even, w_odd, wc, bc


def init_params(key):
    """Deterministic parameters with PyTorch-convention shapes."""
    k1, k2, k3, k4, k5, k6 = jax.random.split(key, 6)
    conv_w = jax.random.uniform(k1, (N_CH, 1, 3), jnp.float32, -0.5, 0.5)
    conv_b = jax.random.uniform(k2, (N_CH,), jnp.float32, -0.5, 0.5)
    fc1_w = jax.random.uniform(k3, (H1, N_FEAT), jnp.float32, -0.05, 0.05)
    fc1_b = jax.random.uniform(k4, (H1,), jnp.float32, -0.05, 0.05)
    fc2_w = jax.random.uniform(k5, (N_OUT, H1), jnp.float32, -0.1, 0.1)
    fc2_b = jax.random.uniform(k6, (N_OUT,), jnp.float32, -0.1, 0.1)
    return conv_w, conv_b, fc1_w, fc1_b, fc2_w, fc2_b


@jax.jit
def cnn_forward(x, params):
    x2 = jnp.reshape(x, (-1, INPUT_DIM)).astype(jnp.float32)   # torch.reshape(x,(-1,1,28))
    batch = x2.shape[0]

    # ---- layout-only parameter preprocessing (tiny) ----
    w_even, w_odd, wc, bc = _fold_params(params)

    # ---- batch-blocked grid: >=2 steps for larger batches so v7x megacore engages ----
    batch8 = _round_up(batch, 8)
    if batch8 > MEGACORE_SPLIT:
        block_b = min(MAX_BLOCK_B, _round_up(-(-batch8 // 2), 8))
    else:
        block_b = batch8
    padded = _round_up(batch, block_b)
    if padded != batch:
        x2 = jnp.pad(x2, ((0, padded - batch), (0, 0)))
    grid = (padded // block_b,)

    out = pl.pallas_call(
        cnn_kernel,
        out_shape=jax.ShapeDtypeStruct((padded, PAD_OUT), jnp.float32),
        grid=grid,
        in_specs=[
            pl.BlockSpec((block_b, INPUT_DIM), lambda i: (i, 0)),   # x: advances with i
            pl.BlockSpec((INPUT_DIM, PAD_F), lambda i: (0, 0)),     # weights: resident
            pl.BlockSpec((INPUT_DIM, PAD_F), lambda i: (0, 0)),
            pl.BlockSpec((PAD_F, PAD_OUT), lambda i: (0, 0)),
            pl.BlockSpec((1, PAD_OUT), lambda i: (0, 0)),
        ],
        out_specs=pl.BlockSpec((block_b, PAD_OUT), lambda i: (i, 0)),
        compiler_params=pltpu.CompilerParams(
            dimension_semantics=("parallel",)),
    )(x2, w_even, w_odd, wc, bc)

    return out[:batch, :N_OUT]


def reference_forward(x, params):
    """Plain-JAX replica of the PyTorch forward (for verification)."""
    conv_w, conv_b, fc1_w, fc1_b, fc2_w, fc2_b = params
    x3 = jnp.reshape(x, (-1, 1, INPUT_DIM)).astype(jnp.float32)
    batch = x3.shape[0]
    cols = jnp.stack([x3[:, 0, k:k + CONV_OUT] for k in range(3)], axis=-1)   # (B,26,3)
    conv = jnp.einsum('blk,ck->bcl', cols, conv_w[:, 0, :],
                      precision='highest') + conv_b[None, :, None]
    pool = jnp.maximum(conv[:, :, 0::2], conv[:, :, 1::2])                    # (B,32,13)
    flat = pool.reshape(batch, N_FEAT)
    h1 = jnp.dot(flat, fc1_w.T, precision='highest') + fc1_b
    return jnp.dot(h1, fc2_w.T, precision='highest') + fc2_b


if __name__ == "__main__":
    key = jax.random.PRNGKey(0)
    kx, kp = jax.random.split(key)
    params = init_params(kp)

    # Small batch (single grid step).
    x_small = jax.random.normal(kx, (4, INPUT_DIM), jnp.float32)
    out_small = jax.block_until_ready(cnn_forward(x_small, params))
    ref_small = reference_forward(x_small, params)
    np.testing.assert_allclose(np.asarray(out_small), np.asarray(ref_small),
                               rtol=5e-4, atol=5e-4)

    # Batch exercising a 2-step grid + tail padding (still tiny).
    x_big = jax.random.normal(jax.random.fold_in(kx, 1), (300, INPUT_DIM), jnp.float32)
    out_big = jax.block_until_ready(cnn_forward(x_big, params))
    ref_big = reference_forward(x_big, params)
    np.testing.assert_allclose(np.asarray(out_big), np.asarray(ref_big),
                               rtol=5e-4, atol=5e-4)

    print("KERNEL_OK")
</pallas_src>

<mosaic_0001>
module attributes {stable_mosaic.version = 11 : i64} {
  func.func @cnn_kernel(%arg0: i32, %arg1: memref<8x28xf32, #tpu.memory_space<vmem>>, %arg2: memref<28x512xf32, #tpu.memory_space<vmem>>, %arg3: memref<28x512xf32, #tpu.memory_space<vmem>>, %arg4: memref<512x128xf32, #tpu.memory_space<vmem>>, %arg5: memref<1x128xf32, #tpu.memory_space<vmem>>, %arg6: memref<8x128xf32, #tpu.memory_space<vmem>>) attributes {dimension_semantics = [#tpu.dimension_semantics<parallel>], iteration_bounds = array<i64: 1>, scalar_prefetch = 0 : i64, scratch_operands = 0 : i64, tpu.core_type = #tpu.core_type<tc>, window_params = [{transform_indices = @transform_0, window_bounds = array<i64: 8, 28>}, {pipeline_mode = #tpu.pipeline_mode<synchronous>, transform_indices = @transform_1, window_bounds = array<i64: 28, 512>}, {pipeline_mode = #tpu.pipeline_mode<synchronous>, transform_indices = @transform_2, window_bounds = array<i64: 28, 512>}, {pipeline_mode = #tpu.pipeline_mode<synchronous>, transform_indices = @transform_3, window_bounds = array<i64: 512, 128>}, {pipeline_mode = #tpu.pipeline_mode<synchronous>, transform_indices = @transform_4, window_bounds = array<i64: 1, 128>}, {transform_indices = @transform_5, window_bounds = array<i64: 8, 128>}]} {
    %c0 = arith.constant 0 : index
    %c0_0 = arith.constant 0 : index
    %0 = vector.load %arg1[%c0, %c0_0] : memref<8x28xf32, #tpu.memory_space<vmem>>, vector<8x28xf32>
    %c0_1 = arith.constant 0 : index
    %c0_2 = arith.constant 0 : index
    %1 = vector.load %arg2[%c0_1, %c0_2] : memref<28x512xf32, #tpu.memory_space<vmem>>, vector<28x512xf32>
    %cst = arith.constant dense<0.000000e+00> : vector<8x512xf32>
    %2 = tpu.matmul %0, %1, %cst {dimension_numbers = #tpu.dot_dimension_numbers<[1], [0], [0], [1], [0, 0, 1, 1], [], []>, precision = #tpu.contract_precision<fp32>} : vector<8x28xf32>, vector<28x512xf32>, vector<8x512xf32> -> vector<8x512xf32>
    %c0_3 = arith.constant 0 : index
    %c0_4 = arith.constant 0 : index
    %3 = vector.load %arg3[%c0_3, %c0_4] : memref<28x512xf32, #tpu.memory_space<vmem>>, vector<28x512xf32>
    %cst_5 = arith.constant dense<0.000000e+00> : vector<8x512xf32>
    %4 = tpu.matmul %0, %3, %cst_5 {dimension_numbers = #tpu.dot_dimension_numbers<[1], [0], [0], [1], [0, 0, 1, 1], [], []>, precision = #tpu.contract_precision<fp32>} : vector<8x28xf32>, vector<28x512xf32>, vector<8x512xf32> -> vector<8x512xf32>
    %5 = arith.maximumf %2, %4 : vector<8x512xf32>
    %c0_6 = arith.constant 0 : index
    %c0_7 = arith.constant 0 : index
    %6 = vector.load %arg4[%c0_6, %c0_7] : memref<512x128xf32, #tpu.memory_space<vmem>>, vector<512x128xf32>
    %cst_8 = arith.constant dense<0.000000e+00> : vector<8x128xf32>
    %7 = tpu.matmul %5, %6, %cst_8 {dimension_numbers = #tpu.dot_dimension_numbers<[1], [0], [0], [1], [0, 0, 1, 1], [], []>, precision = #tpu.contract_precision<fp32>} : vector<8x512xf32>, vector<512x128xf32>, vector<8x128xf32> -> vector<8x128xf32>
    %c0_9 = arith.constant 0 : index
    %c0_10 = arith.constant 0 : index
    %8 = vector.load %arg5[%c0_9, %c0_10] : memref<1x128xf32, #tpu.memory_space<vmem>>, vector<1x128xf32>
    %9 = vector.broadcast %8 : vector<1x128xf32> to vector<8x128xf32>
    %10 = arith.addf %7, %9 : vector<8x128xf32>
    %c0_11 = arith.constant 0 : index
    %c0_12 = arith.constant 0 : index
    %11 = vector.load %arg6[%c0_11, %c0_12] : memref<8x128xf32, #tpu.memory_space<vmem>>, vector<8x128xf32>
    tpu.vector_store %arg6[%c0_11, %c0_12], %10 {strides = array<i32>} : memref<8x128xf32, #tpu.memory_space<vmem>>, vector<8x128xf32>,
    return
  }
  func.func @transform_0(%arg0: i32) -> (i32, i32) {
    %c0_i32 = arith.constant 0 : i32
    %c0_i32_0 = arith.constant 0 : i32
    return %arg0, %c0_i32 : i32, i32
  }
  func.func @transform_1(%arg0: i32) -> (i32, i32) {
    %c0_i32 = arith.constant 0 : i32
    %c0_i32_0 = arith.constant 0 : i32
    %c0_i32_1 = arith.constant 0 : i32
    return %c0_i32, %c0_i32_0 : i32, i32
  }
  func.func @transform_2(%arg0: i32) -> (i32, i32) {
    %c0_i32 = arith.constant 0 : i32
    %c0_i32_0 = arith.constant 0 : i32
    %c0_i32_1 = arith.constant 0 : i32
    return %c0_i32, %c0_i32_0 : i32, i32
  }
  func.func @transform_3(%arg0: i32) -> (i32, i32) {
    %c0_i32 = arith.constant 0 : i32
    %c0_i32_0 = arith.constant 0 : i32
    %c0_i32_1 = arith.constant 0 : i32
    return %c0_i32, %c0_i32_0 : i32, i32
  }
  func.func @transform_4(%arg0: i32) -> (i32, i32) {
    %c0_i32 = arith.constant 0 : i32
    %c0_i32_0 = arith.constant 0 : i32
    %c0_i32_1 = arith.constant 0 : i32
    return %c0_i32, %c0_i32_0 : i32, i32
  }
  func.func @transform_5(%arg0: i32) -> (i32, i32) {
    %c0_i32 = arith.constant 0 : i32
    %c0_i32_0 = arith.constant 0 : i32
    return %arg0, %c0_i32 : i32, i32
  }
}

</mosaic_0001>

<bundles_post_ra>
// kernel: cnn_forward.1
= control target key start
LH: loop header
LB: loop body
LE: loop exit
PB: predicated region body
PF: predicated region fallthrough
CT: control target
= control target key end

     0   :  { %vm41_vm0 = vcmask 1043456   ;;  %v4480_v3 = vmov 0.0   ;;  %vm37_vm1 = vcmask 228352   ;;  %s6459_s1 = inlined_call_operand.vmem [shape: f32[28,512], index: 1, kind: input, shape index: {}]   ;;  %s6460_s0 = inlined_call_operand.vmem [shape: f32[8,28], index: 0, kind: input, shape index: {}]   ;;  %s6461_s2 = inlined_call_operand.vmem [shape: f32[28,512], index: 2, kind: input, shape index: {}]   ;;  %s6462_s3 = inlined_call_operand.vmem [shape: f32[512,128], index: 3, kind: input, shape index: {}]   ;;  %s6463_s4 = inlined_call_operand.vmem [shape: f32[1,128], index: 4, kind: input, shape index: {}]   ;;  %s6464_s5 = inlined_call_operand.vmem [shape: f32[8,128], index: 5, kind: output, shape index: {}]  }
   0x1   :  { %v34_v0 = vld [vmem:[%s6459_s1 + $0x68] sm:$0xf]  ;;  %v33_v1 = vld [vmem:[%s6459_s1 + $0x60] sm:$0xf]  ;;  %126 = vmatprep.mubr.f32.mxu0 %v4480_v3  ;;  %242 = vmatprep.mubr.f32.mxu1 %v4480_v3  ;;  %v36_v57 = vld [vmem:[%s6459_s1 + $0x78] sm:$0xf] }
   0x2   :  { %v30_v2 = vld [vmem:[%s6459_s1 + $0x48] sm:$0xff]  ;;  %v46_v4 = vsel %vm41_vm0, %v34_v0, 0  ;;  %v43_v5 = vsel %vm41_vm0, %v33_v1, 0  ;;  %v29_v7 = vld [vmem:[%s6459_s1 + $0x40] sm:$0xff]  ;;  %v35_v58 = vld [vmem:[%s6459_s1 + $0x70] sm:$0xf] }
   0x3   :  { %v4524_v6 = vand.u32 4294901760, %v30_v2  ;;  %v26_v8 = vld [vmem:[%s6459_s1 + $0x28] sm:$0xff]  ;;  %v25_v9 = vld [vmem:[%s6459_s1 + $0x20] sm:$0xff]  ;;  %v4535_v10 = vand.u32 4294901760, %v46_v4  ;;  %v4537_v11 = vand.u32 4294901760, %v43_v5  ;;  %v4539_v12 = vand.u32 4294901760, %v29_v7 }
   0x4   :  { %v4541_v13 = vand.u32 4294901760, %v26_v8  ;;  %v22_v14 = vld [vmem:[%s6459_s1 + $0x8] sm:$0xff]  ;;  %v21_v15 = vld [vmem:[%s6459_s1] sm:$0xff]  ;;  %v4549_v16 = vand.u32 4294901760, %v25_v9  ;;  %v52_v60 = vsel %vm41_vm0, %v36_v57, 0  ;;  %v49_v61 = vsel %vm41_vm0, %v35_v58, 0 }
   0x5   :  { %v4551_v17 = vand.u32 4294901760, %v22_v14  ;;  %v4553_v18 = vand.u32 4294901760, %v21_v15  ;;  %v4556_v19 = vsub.f32 %v30_v2, %v4524_v6  ;;  %v20_v20 = vld [vmem:[%s6460_s0] sm:$0xff]  ;;  %79 = vmatprep.subr.mxu0 %v4535_v10  ;;  %v4563_v21 = vsub.f32 %v46_v4, %v4535_v10  ;;  %v32_v62 = vld [vmem:[%s6459_s1 + $0x58] sm:$0xff]  ;;  %v31_v1 = vld [vmem:[%s6459_s1 + $0x50] sm:$0xff] }
   0x6   :  { %v4566_v22 = vsub.f32 %v43_v5, %v4537_v11  ;;  %v39_v23 = vsel %vm37_vm1, %v20_v20, 0  ;;  %v4570_v24 = vsub.f32 %v29_v7, %v4539_v12  ;;  %81 = vmatpush1.msra.mxu0 %v4537_v11  ;;  %v4577_v27 = vsub.f32 %v26_v8, %v4541_v13  ;;  %v28_v4 = vld [vmem:[%s6459_s1 + $0x38] sm:$0xff]  ;;  %v27_v5 = vld [vmem:[%s6459_s1 + $0x30] sm:$0xff]  ;;  %v1145_v58 = vld [vmem:[%s6461_s2 + $0x28] sm:$0xff] }
   0x7   :  { %v176_v25 = vand.u32 4294901760, %v4556_v19  ;;  %v4574_v26 = vand.u32 4294901760, %v39_v23  ;;  %v4580_v28 = vsub.f32 %v25_v9, %v4549_v16  ;;  %83 = vmatprep.subr.mxu0 %v4524_v6  ;;  %v164_v29 = vand.u32 4294901760, %v4563_v21  ;;  %v24_v8 = vld [vmem:[%s6459_s1 + $0x18] sm:$0xff]  ;;  %v23_v20 = vld [vmem:[%s6459_s1 + $0x10] sm:$0xff] }
   0x8   :  { %v170_v30 = vand.u32 4294901760, %v4566_v22  ;;  %v182_v31 = vand.u32 4294901760, %v4570_v24  ;;  %v4587_v32 = vsub.f32 %v22_v14, %v4551_v17  ;;  %85 = vmatpush1.msra.mxu0 %v4539_v12  ;;  %v188_v35 = vand.u32 4294901760, %v4577_v27 }
   0x9   :  { %v177_v33 = vsub.f32 %v4556_v19, %v176_v25  ;;  %v4594_v34 = vsub.f32 %v39_v23, %v4574_v26  ;;  %v194_v36 = vand.u32 4294901760, %v4580_v28  ;;  %87 = vmatprep.subr.mxu0 %v4541_v13  ;;  %v165_v37 = vsub.f32 %v4563_v21, %v164_v29 }
   0xa   :  { %v171_v38 = vsub.f32 %v4566_v22, %v170_v30  ;;  %v183_v39 = vsub.f32 %v4570_v24, %v182_v31  ;;  %v200_v40 = vand.u32 4294901760, %v4587_v32  ;;  %89 = vmatpush1.msra.mxu0 %v4549_v16  ;;  %v189_v42 = vsub.f32 %v4577_v27, %v188_v35 }
   0xb   :  { %v4611_v41 = vand.u32 4294901760, %v4594_v34  ;;  %v195_v43 = vsub.f32 %v4580_v28, %v194_v36  ;;  %91 = vmatprep.subr.mxu0 %v4551_v17  ;;  %v166_v44 = vand.u32 4294901760, %v165_v37  ;;  %v178_v46 = vand.u32 4294901760, %v177_v33 }
   0xc   :  { %v172_v45 = vand.u32 4294901760, %v171_v38  ;;  %v201_v47 = vsub.f32 %v4587_v32, %v200_v40  ;;  %93 = vmatpush1.msra.mxu0 %v4553_v18  ;;  %v184_v49 = vand.u32 4294901760, %v183_v39  ;;  %v4627_v50 = vsub.f32 %v21_v15, %v4553_v18 }
   0xd   :  { %v130_v48 = vsub.f32 %v4594_v34, %v4611_v41  ;;  %167 = vmatprep.subr.mxu1 %v166_v44  ;;  %276 = vmatprep.subr.mxu0 %v4563_v21  ;;  %v190_v51 = vand.u32 4294901760, %v189_v42  ;;  %v196_v53 = vand.u32 4294901760, %v195_v43  ;;  %v4656_v63 = vand.u32 4294901760, %v52_v60 }
   0xe   :  { %173 = vmatpush1.msra.mxu1 %v172_v45  ;;  %v206_v54 = vand.u32 4294901760, %v4627_v50  ;;  %v202_v55 = vand.u32 4294901760, %v201_v47  ;;  %v4660_v0 = vand.u32 4294901760, %v49_v61  ;;  %v4667_v2 = vand.u32 4294901760, %v32_v62 }
   0xf   :  { %v4630_v52 = vand.u32 4294901760, %v130_v48  ;;  %179 = vmatprep.subr.mxu1 %v178_v46  ;;  %v4681_v7 = vand.u32 4294901760, %v31_v1  ;;  %v4687_v9 = vsub.f32 %v52_v60, %v4656_v63  ;;  %v4695_v15 = vand.u32 4294901760, %v28_v4  ;;  %v1153_v48 = vld [vmem:[%s6461_s2 + $0x68] sm:$0xf] }
  0x10   :  { %185 = vmatpush1.msra.mxu1 %v184_v49  ;;  %v207_v56 = vsub.f32 %v4627_v50, %v206_v54  ;;  %v4693_v14 = vsub.f32 %v49_v61, %v4660_v0  ;;  %v4703_v21 = vand.u32 4294901760, %v27_v5  ;;  %v1152_v49 = vld [vmem:[%s6461_s2 + $0x60] sm:$0xf]  ;;  %v1141_v61 = vld [vmem:[%s6461_s2 + $0x8] sm:$0xff] }
  0x11   :  { %132 = vmatmul.mubr.f32.vlgmr.msra.gmra.mxu0 %v4630_v52  ;;  %191 = vmatprep.subr.mxu1 %v190_v51  ;;  %v4716_v23 = vsub.f32 %v31_v1, %v4681_v7  ;;  %v1157_v51 = vsel %vm41_vm0, %v1152_v49, 0  ;;  %v1146_v49 = vld [vmem:[%s6461_s2 + $0x30] sm:$0xff] }
  0x12   :  { %279 = vmatpush1.msra.mxu0 %v4566_v22  ;;  %197 = vmatpush1.msra.mxu1 %v196_v53  ;;  %v208_v59 = vand.u32 4294901760, %v207_v56  ;;  %v4706_v22 = vsub.f32 %v32_v62, %v4667_v2  ;;  %v1149_v53 = vld [vmem:[%s6461_s2 + $0x48] sm:$0xff]  ;;  %v1148_v56 = vld [vmem:[%s6461_s2 + $0x40] sm:$0xff] }
  0x13   :  { %282 = vmatprep.subr.mxu0 %v4556_v19  ;;  %203 = vmatprep.subr.mxu1 %v202_v55  ;;  %v4711_v19 = vand.u32 4294901760, %v24_v8  ;;  %v725_v33 = vand.u32 4294901760, %v4716_v23  ;;  %v4818_v55 = vand.u32 4294901760, %v1157_v51  ;;  %v4825_v57 = vand.u32 4294901760, %v1149_v53 }
  0x14   :  { %285 = vmatpush1.msra.mxu0 %v4570_v24  ;;  %209 = vmatpush1.msra.mxu1 %v208_v59  ;;  %v707_v24 = vand.u32 4294901760, %v4687_v9  ;;  %v1144_v59 = vld [vmem:[%s6461_s2 + $0x20] sm:$0xff]  ;;  %v4839_v60 = vand.u32 4294901760, %v1148_v56 }
  0x15   :  { %288 = vmatprep.subr.mxu0 %v4577_v27  ;;  %244 = vmatmul.mubr.f32.vlgmr.msra.gmra.mxu1 %v4574_v26  ;;  %v713_v27 = vand.u32 4294901760, %v4693_v14  ;;  %v4851_v1 = vsub.f32 %v1157_v51, %v4818_v55  ;;  %v1143_v51 = vld [vmem:[%s6461_s2 + $0x18] sm:$0xff] }
  0x16   :  { %291 = vmatpush1.msra.mxu0 %v4580_v28  ;;  %364 = vmatprep.subr.mxu1 %v4535_v10  ;;  %v4739_v28 = vsub.f32 %v24_v8, %v4711_v19  ;;  %v4861_v8 = vand.u32 4294901760, %v1144_v59 }
  0x17   :  { %294 = vmatprep.subr.mxu0 %v4587_v32  ;;  %330 = vmatprep.mubr.f32.mxu0 %v4480_v3 }
  0x18   :  { %297 = vmatpush1.msra.mxu0 %v4627_v50  ;;  %366 = vmatpush1.msra.mxu1 %v4537_v11  ;;  %v1160_v50 = vsel %vm41_vm0, %v1153_v48, 0 }
  0x19   :  { %333 = vmatmul.mubr.f32.vlgmr.msra.gmra.mxu0 %v4594_v34  ;;  %368 = vmatprep.subr.mxu1 %v4524_v6 }
  0x1a   :  { %448 = vmatprep.subr.mxu0 %v164_v29  ;;  %370 = vmatpush1.msra.mxu1 %v4539_v12  ;;  %v4726_v29 = vsub.f32 %v28_v4, %v4695_v15  ;;  %v4853_v4 = vand.u32 4294901760, %v1145_v58 }
  0x1b   :  { %452 = vmatpush1.msra.mxu0 %v170_v30  ;;  %372 = vmatprep.subr.mxu1 %v4541_v13  ;;  %v4732_v30 = vsub.f32 %v27_v5, %v4703_v21  ;;  %v1140_v5 = vld [vmem:[%s6461_s2] sm:$0xff] }
  0x1c   :  { %456 = vmatprep.subr.mxu0 %v176_v25  ;;  %374 = vmatpush1.msra.mxu1 %v4549_v16  ;;  %v4719_v25 = vand.u32 4294901760, %v23_v20 }
  0x1d   :  { %460 = vmatpush1.msra.mxu0 %v182_v31  ;;  %376 = vmatprep.subr.mxu1 %v4551_v17  ;;  %v719_v31 = vand.u32 4294901760, %v4706_v22  ;;  %v737_v37 = vand.u32 4294901760, %v4732_v30 }
  0x1e   :  { %464 = vmatprep.subr.mxu0 %v188_v35  ;;  %378 = vmatpush1.msra.mxu1 %v4553_v18  ;;  %v4747_v32 = vsub.f32 %v23_v20, %v4719_v25  ;;  %v714_v35 = vsub.f32 %v4693_v14, %v713_v27  ;;  %v4874_v20 = vsub.f32 %v1148_v56, %v4839_v60 }
  0x1f   :  { %411 = vmatprep.mubr.f32.mxu1 %v4480_v3  ;;  %468 = vmatpush1.msra.mxu0 %v194_v36  ;;  %v720_v36 = vsub.f32 %v4706_v22, %v719_v31  ;;  %v738_v42 = vsub.f32 %v4732_v30, %v737_v37 }
  0x20   :  { %415 = vmatmul.mubr.f32.vlgmr.msra.gmra.mxu1 %v4611_v41  ;;  %472 = vmatprep.subr.mxu0 %v200_v40  ;;  %v749_v39 = vand.u32 4294901760, %v4747_v32 }
  0x21   :  { %542 = vmatprep.subr.mxu1 %v4535_v10  ;;  %476 = vmatpush1.msra.mxu0 %v206_v54  ;;  %v708_v10 = vsub.f32 %v4687_v9, %v707_v24  ;;  %v739_v45 = vand.u32 4294901760, %v738_v42  ;;  %v4814_v54 = vand.u32 4294901760, %v1160_v50  ;;  %v1154_v42 = vld [vmem:[%s6461_s2 + $0x70] sm:$0xf] }
  0x22   :  { %509 = vmatprep.mubr.f32.mxu0 %v4480_v3  ;;  %544 = vmatpush1.msra.mxu1 %v4537_v11  ;;  %v731_v11 = vand.u32 4294901760, %v4726_v29 }
  0x23   :  { %511 = vmatmul.mubr.f32.vlgmr.msra.gmra.mxu0 %v4574_v26  ;;  %546 = vmatprep.subr.mxu1 %v4524_v6  ;;  %v743_v6 = vand.u32 4294901760, %v4739_v28  ;;  %v709_v38 = vand.u32 4294901760, %v708_v10  ;;  %v4845_v62 = vsub.f32 %v1160_v50, %v4814_v54  ;;  %v1296_v10 = vand.u32 4294901760, %v4874_v20 }
  0x24   :  { %622 = vmatprep.subr.mxu0 %v4656_v63  ;;  %548 = vmatpush1.msra.mxu1 %v4539_v12  ;;  %v726_v12 = vsub.f32 %v4716_v23, %v725_v33  ;;  %v732_v40 = vsub.f32 %v4726_v29, %v731_v11 }
  0x25   :  { %624 = vmatpush1.msra.mxu0 %v4660_v0  ;;  %550 = vmatprep.subr.mxu1 %v4541_v13  ;;  %v715_v13 = vand.u32 4294901760, %v714_v35 }
  0x26   :  { %626 = vmatprep.subr.mxu0 %v4667_v2  ;;  %552 = vmatpush1.msra.mxu1 %v4549_v16  ;;  %v721_v16 = vand.u32 4294901760, %v720_v36  ;;  %v727_v43 = vand.u32 4294901760, %v726_v12  ;;  %v733_v44 = vand.u32 4294901760, %v732_v40  ;;  %v1155_v40 = vld [vmem:[%s6461_s2 + $0x78] sm:$0xf] }
  0x27   :  { %628 = vmatpush1.msra.mxu0 %v4681_v7  ;;  %554 = vmatprep.subr.mxu1 %v4551_v17  ;;  %v744_v17 = vsub.f32 %v4739_v28, %v743_v6 }
  0x28   :  { %630 = vmatprep.subr.mxu0 %v4695_v15  ;;  %556 = vmatpush1.msra.mxu1 %v4553_v18  ;;  %v750_v18 = vsub.f32 %v4747_v32, %v749_v39 }
  0x29   :  { %589 = vmatprep.mubr.f32.mxu1 %v4480_v3  ;;  %632 = vmatpush1.msra.mxu0 %v4703_v21  ;;  %v745_v46 = vand.u32 4294901760, %v744_v17  ;;  %v1166_v17 = vsel %vm41_vm0, %v1155_v40, 0 }
  0x2a   :  { %591 = vmatmul.mubr.f32.vlgmr.msra.gmra.mxu1 %v4574_v26  ;;  %634 = vmatprep.subr.mxu0 %v4711_v19  ;;  %v751_v47 = vand.u32 4294901760, %v750_v18  ;;  %v1151_v18 = vld [vmem:[%s6461_s2 + $0x58] sm:$0xff] }
  0x2b   :  { %710 = vmatprep.subr.mxu1 %v709_v38  ;;  %636 = vmatpush1.msra.mxu0 %v4719_v25  ;;  %v4984_v48 = vand.u32 4294901760, %v1151_v18 }
  0x2c   :  { %716 = vmatpush1.msra.mxu1 %v715_v13  ;;  %669 = vmatprep.mubr.f32.mxu0 %v4480_v3 }
  0x2d   :  { %722 = vmatprep.subr.mxu1 %v721_v16  ;;  %819 = vmatprep.subr.mxu0 %v4687_v9  ;;  %v4864_v9 = vsub.f32 %v1149_v53, %v4825_v57 }
  0x2e   :  { %675 = vmatmul.mubr.f32.vlgmr.msra.gmra.mxu0 %v4630_v52  ;;  %728 = vmatpush1.msra.mxu1 %v727_v43  ;;  %v1163_v43 = vsel %vm41_vm0, %v1154_v42, 0 }
  0x2f   :  { %822 = vmatpush1.msra.mxu0 %v4693_v14  ;;  %734 = vmatprep.subr.mxu1 %v733_v44  ;;  %v4869_v14 = vand.u32 4294901760, %v1141_v61  ;;  %v4970_v44 = vand.u32 4294901760, %v1166_v17 }
  0x30   :  { %825 = vmatprep.subr.mxu0 %v4706_v22  ;;  %740 = vmatpush1.msra.mxu1 %v739_v45  ;;  %v1278_v22 = vand.u32 4294901760, %v4845_v62  ;;  %v1150_v45 = vld [vmem:[%s6461_s2 + $0x50] sm:$0xff] }
  0x31   :  { %828 = vmatpush1.msra.mxu0 %v4716_v23  ;;  %746 = vmatprep.subr.mxu1 %v745_v46  ;;  %v4877_v23 = vand.u32 4294901760, %v1140_v5  ;;  %v4977_v46 = vand.u32 4294901760, %v1163_v43  ;;  %v4991_v50 = vand.u32 4294901760, %v1150_v45  ;;  %v5000_v53 = vsub.f32 %v1166_v17, %v4970_v44 }
  0x32   :  { %831 = vmatprep.subr.mxu0 %v4726_v29  ;;  %752 = vmatpush1.msra.mxu1 %v751_v47  ;;  %v4890_v29 = vsub.f32 %v1144_v59, %v4861_v8  ;;  %v1147_v47 = vld [vmem:[%s6461_s2 + $0x38] sm:$0xff] }
  0x33   :  { %785 = vmatprep.mubr.f32.mxu1 %v4480_v3  ;;  %834 = vmatpush1.msra.mxu0 %v4732_v30  ;;  %v4897_v30 = vsub.f32 %v1141_v61, %v4869_v14  ;;  %v5002_v56 = vand.u32 4294901760, %v1147_v47  ;;  %v5011_v59 = vsub.f32 %v1163_v43, %v4977_v46  ;;  %v5013_v61 = vand.u32 4294901760, %v1146_v49 }
  0x34   :  { %787 = vmatmul.mubr.f32.vlgmr.msra.gmra.mxu1 %v4574_v26  ;;  %837 = vmatprep.subr.mxu0 %v4739_v28  ;;  %v4905_v28 = vsub.f32 %v1140_v5, %v4877_v23  ;;  %v1308_v35 = vand.u32 4294901760, %v4890_v29  ;;  %v5021_v5 = vand.u32 4294901760, %v1143_v51 }
  0x35   :  { %907 = vmatprep.subr.mxu1 %v4656_v63  ;;  %840 = vmatpush1.msra.mxu0 %v4747_v32 }
  0x36   :  { %873 = vmatprep.mubr.f32.mxu0 %v4480_v3  ;;  %909 = vmatpush1.msra.mxu1 %v4660_v0  ;;  %v1320_v36 = vand.u32 4294901760, %v4905_v28 }
  0x37   :  { %876 = vmatmul.mubr.f32.vlgmr.msra.gmra.mxu0 %v4594_v34  ;;  %911 = vmatprep.subr.mxu1 %v4667_v2 }
  0x38   :  { %991 = vmatprep.subr.mxu0 %v707_v24  ;;  %913 = vmatpush1.msra.mxu1 %v4681_v7  ;;  %v1284_v24 = vand.u32 4294901760, %v4851_v1 }
  0x39   :  { %995 = vmatpush1.msra.mxu0 %v713_v27  ;;  %915 = vmatprep.subr.mxu1 %v4695_v15  ;;  %v4884_v27 = vsub.f32 %v1145_v58, %v4853_v4  ;;  %v1142_v58 = vld [vmem:[%s6461_s2 + $0x10] sm:$0xff] }
  0x3a   :  { %999 = vmatprep.subr.mxu0 %v719_v31  ;;  %917 = vmatpush1.msra.mxu1 %v4703_v21  ;;  %v1290_v31 = vand.u32 4294901760, %v4864_v9  ;;  %v1285_v32 = vsub.f32 %v4851_v1, %v1284_v24 }
  0x3b   :  { %1003 = vmatpush1.msra.mxu0 %v725_v33  ;;  %919 = vmatprep.subr.mxu1 %v4711_v19 }
  0x3c   :  { %1007 = vmatprep.subr.mxu0 %v731_v11  ;;  %921 = vmatpush1.msra.mxu1 %v4719_v25  ;;  %v1291_v33 = vsub.f32 %v4864_v9, %v1290_v31 }
  0x3d   :  { %954 = vmatprep.mubr.f32.mxu1 %v4480_v3  ;;  %1011 = vmatpush1.msra.mxu0 %v737_v37 }
  0x3e   :  { %958 = vmatmul.mubr.f32.vlgmr.msra.gmra.mxu1 %v4611_v41  ;;  %1015 = vmatprep.subr.mxu0 %v743_v6  ;;  %v1309_v6 = vsub.f32 %v4890_v29, %v1308_v35 }
  0x3f   :  { %1085 = vmatprep.subr.mxu1 %v4656_v63  ;;  %1019 = vmatpush1.msra.mxu0 %v749_v39  ;;  %v1279_v63 = vsub.f32 %v4845_v62, %v1278_v22 }
  0x40   :  { %1052 = vmatprep.mubr.f32.mxu0 %v4480_v3  ;;  %1087 = vmatpush1.msra.mxu1 %v4660_v0  ;;  %v1302_v0 = vand.u32 4294901760, %v4884_v27  ;;  %v1310_v39 = vand.u32 4294901760, %v1309_v6 }
  0x41   :  { %1054 = vmatmul.mubr.f32.vlgmr.msra.gmra.mxu0 %v4574_v26  ;;  %1089 = vmatprep.subr.mxu1 %v4667_v2  ;;  %v1314_v2 = vand.u32 4294901760, %v4897_v30  ;;  %v1280_v11 = vand.u32 4294901760, %v1279_v63  ;;  %v5049_v63 = vsub.f32 %v1143_v51, %v5021_v5 }
  0x42   :  { %1193 = vmatprep.subr.mxu0 %v4814_v54  ;;  %1091 = vmatpush1.msra.mxu1 %v4681_v7  ;;  %v1297_v7 = vsub.f32 %v4874_v20, %v1296_v10  ;;  %v1303_v37 = vsub.f32 %v4884_v27, %v1302_v0 }
  0x43   :  { %1195 = vmatpush1.msra.mxu0 %v4818_v55  ;;  %1093 = vmatprep.subr.mxu1 %v4695_v15  ;;  %v1286_v15 = vand.u32 4294901760, %v1285_v32 }
  0x44   :  { %1197 = vmatprep.subr.mxu0 %v4825_v57  ;;  %1095 = vmatpush1.msra.mxu1 %v4703_v21  ;;  %v1292_v21 = vand.u32 4294901760, %v1291_v33  ;;  %v1298_v38 = vand.u32 4294901760, %v1297_v7  ;;  %v1304_v12 = vand.u32 4294901760, %v1303_v37  ;;  %v1857_v33 = vand.u32 4294901760, %v5049_v63 }
  0x45   :  { %1199 = vmatpush1.msra.mxu0 %v4839_v60  ;;  %1097 = vmatprep.subr.mxu1 %v4711_v19  ;;  %v1315_v19 = vsub.f32 %v4897_v30, %v1314_v2 }
  0x46   :  { %1201 = vmatprep.subr.mxu0 %v4853_v4  ;;  %1099 = vmatpush1.msra.mxu1 %v4719_v25  ;;  %v1321_v25 = vsub.f32 %v4905_v28, %v1320_v36  ;;  %v1858_v7 = vsub.f32 %v5049_v63, %v1857_v33 }
  0x47   :  { %1132 = vmatprep.mubr.f32.mxu1 %v4480_v3  ;;  %1203 = vmatpush1.msra.mxu0 %v4861_v8  ;;  %v1316_v13 = vand.u32 4294901760, %v1315_v19  ;;  %v2272_v19 = vld [vmem:[%s6462_s3 + $0x70] sm:$0xff] }
  0x48   :  { %1134 = vmatmul.mubr.f32.vlgmr.msra.gmra.mxu1 %v4574_v26  ;;  %1205 = vmatprep.subr.mxu0 %v4869_v14  ;;  %v1322_v16 = vand.u32 4294901760, %v1321_v25  ;;  %v1859_v37 = vand.u32 4294901760, %v1858_v7  ;;  %v5184_v25 = vand.u32 4294901760, %v2272_v19 }
  0x49   :  { %1281 = vmatprep.subr.mxu1 %v1280_v11  ;;  %1207 = vmatpush1.msra.mxu0 %v4877_v23 }
  0x4a   :  { %1287 = vmatpush1.msra.mxu1 %v1286_v15  ;;  %1240 = vmatprep.mubr.f32.mxu0 %v4480_v3  ;;  %v5204_v43 = vsub.f32 %v2272_v19, %v5184_v25 }
  0x4b   :  { %1293 = vmatprep.subr.mxu1 %v1292_v21  ;;  %1390 = vmatprep.subr.mxu0 %v4845_v62  ;;  %v5019_v62 = vsub.f32 %v1151_v18, %v4984_v48  ;;  %v2286_v18 = vld [vmem:[%s6462_s3 + $0xe0] sm:$0xff] }
  0x4c   :  { %1246 = vmatmul.mubr.f32.vlgmr.msra.gmra.mxu0 %v4630_v52  ;;  %1299 = vmatpush1.msra.mxu1 %v1298_v38  ;;  %v5228_v51 = vand.u32 4294901760, %v2286_v18 }
  0x4d   :  { %1393 = vmatpush1.msra.mxu0 %v4851_v1  ;;  %1305 = vmatprep.subr.mxu1 %v1304_v12  ;;  %v5027_v1 = vsub.f32 %v1150_v45, %v4991_v50  ;;  %v2287_v12 = vld [vmem:[%s6462_s3 + $0xe8] sm:$0xff] }
  0x4e   :  { %1396 = vmatprep.subr.mxu0 %v4864_v9  ;;  %1311 = vmatpush1.msra.mxu1 %v1310_v39  ;;  %v1821_v9 = vand.u32 4294901760, %v5000_v53  ;;  %v2271_v39 = vld [vmem:[%s6462_s3 + $0x68] sm:$0xff] }
  0x4f   :  { %1399 = vmatpush1.msra.mxu0 %v4874_v20  ;;  %1317 = vmatprep.subr.mxu1 %v1316_v13  ;;  %v1827_v20 = vand.u32 4294901760, %v5011_v59  ;;  %v5199_v42 = vand.u32 4294901760, %v2271_v39 }
  0x50   :  { %1402 = vmatprep.subr.mxu0 %v4884_v27  ;;  %1323 = vmatpush1.msra.mxu1 %v1322_v16  ;;  %v1833_v27 = vand.u32 4294901760, %v5019_v62  ;;  %v5197_v16 = vand.u32 4294901760, %v2287_v12 }
  0x51   :  { %1356 = vmatprep.mubr.f32.mxu1 %v4480_v3  ;;  %1405 = vmatpush1.msra.mxu0 %v4890_v29  ;;  %v1822_v29 = vsub.f32 %v5000_v53, %v1821_v9 }
  0x52   :  { %1358 = vmatmul.mubr.f32.vlgmr.msra.gmra.mxu1 %v4574_v26  ;;  %1408 = vmatprep.subr.mxu0 %v4897_v30 }
  0x53   :  { %1478 = vmatprep.subr.mxu1 %v4814_v54  ;;  %1411 = vmatpush1.msra.mxu0 %v4905_v28  ;;  %v1834_v28 = vsub.f32 %v5019_v62, %v1833_v27 }
  0x54   :  { %1444 = vmatprep.mubr.f32.mxu0 %v4480_v3  ;;  %1480 = vmatpush1.msra.mxu1 %v4818_v55 }
  0x55   :  { %1447 = vmatmul.mubr.f32.vlgmr.msra.gmra.mxu0 %v4594_v34  ;;  %1482 = vmatprep.subr.mxu1 %v4825_v57 }
  0x56   :  { %1562 = vmatprep.subr.mxu0 %v1278_v22  ;;  %1484 = vmatpush1.msra.mxu1 %v4839_v60  ;;  %v5029_v22 = vand.u32 4294901760, %v1142_v58 }
  0x57   :  { %1566 = vmatpush1.msra.mxu0 %v1284_v24  ;;  %1486 = vmatprep.subr.mxu1 %v4853_v4  ;;  %v5036_v24 = vsub.f32 %v1147_v47, %v5002_v56  ;;  %v5218_v47 = vsub.f32 %v2271_v39, %v5199_v42 }
  0x58   :  { %1570 = vmatprep.subr.mxu0 %v1290_v31  ;;  %1488 = vmatpush1.msra.mxu1 %v4861_v8  ;;  %v5042_v31 = vsub.f32 %v1146_v49, %v5013_v61  ;;  %v5056_v32 = vsub.f32 %v1142_v58, %v5029_v22 }
  0x59   :  { %1574 = vmatpush1.msra.mxu0 %v1296_v10  ;;  %1490 = vmatprep.subr.mxu1 %v4869_v14  ;;  %v1839_v10 = vand.u32 4294901760, %v5027_v1 }
  0x5a   :  { %1578 = vmatprep.subr.mxu0 %v1302_v0  ;;  %1492 = vmatpush1.msra.mxu1 %v4877_v23  ;;  %v1845_v0 = vand.u32 4294901760, %v5036_v24  ;;  %v1851_v30 = vand.u32 4294901760, %v5042_v31 }
  0x5b   :  { %1525 = vmatprep.mubr.f32.mxu1 %v4480_v3  ;;  %1582 = vmatpush1.msra.mxu0 %v1308_v35  ;;  %v1863_v35 = vand.u32 4294901760, %v5056_v32 }
  0x5c   :  { %1529 = vmatmul.mubr.f32.vlgmr.msra.gmra.mxu1 %v4611_v41  ;;  %1586 = vmatprep.subr.mxu0 %v1314_v2  ;;  %v1846_v2 = vsub.f32 %v5036_v24, %v1845_v0  ;;  %v1852_v11 = vsub.f32 %v5042_v31, %v1851_v30 }
  0x5d   :  { %1656 = vmatprep.subr.mxu1 %v4814_v54  ;;  %1590 = vmatpush1.msra.mxu0 %v1320_v36  ;;  %v1828_v54 = vsub.f32 %v5011_v59, %v1827_v20  ;;  %v1864_v36 = vsub.f32 %v5056_v32, %v1863_v35 }
  0x5e   :  { %1623 = vmatprep.mubr.f32.mxu0 %v4480_v3  ;;  %1658 = vmatpush1.msra.mxu1 %v4818_v55  ;;  %v1840_v55 = vsub.f32 %v5027_v1, %v1839_v10  ;;  %v1853_v15 = vand.u32 4294901760, %v1852_v11 }
  0x5f   :  { %1625 = vmatmul.mubr.f32.vlgmr.msra.gmra.mxu0 %v4574_v26  ;;  %1660 = vmatprep.subr.mxu1 %v4825_v57  ;;  %v1823_v57 = vand.u32 4294901760, %v1822_v29 }
  0x60   :  { %1736 = vmatprep.subr.mxu0 %v4970_v44  ;;  %1662 = vmatpush1.msra.mxu1 %v4839_v60  ;;  %v1829_v60 = vand.u32 4294901760, %v1828_v54 }
  0x61   :  { %1703 = vmatprep.mubr.f32.mxu1 %v4480_v3  ;;  %1664 = vmatprep.subr.mxu1 %v4853_v4  ;;  %v1835_v4 = vand.u32 4294901760, %v1834_v28  ;;  %v2283_v28 = vld [vmem:[%s6462_s3 + $0xc8] sm:$0xff] }
  0x62   :  { %1738 = vmatpush1.msra.mxu0 %v4977_v46  ;;  %1666 = vmatpush1.msra.mxu1 %v4861_v8  ;;  %v1841_v8 = vand.u32 4294901760, %v1840_v55 }
  0x63   :  { %1740 = vmatprep.subr.mxu0 %v4984_v48  ;;  %1668 = vmatprep.subr.mxu1 %v4869_v14  ;;  %v1847_v14 = vand.u32 4294901760, %v1846_v2  ;;  %v2267_v2 = vld [vmem:[%s6462_s3 + $0x48] sm:$0xff] }
  0x64   :  { %1742 = vmatpush1.msra.mxu0 %v4991_v50  ;;  %1670 = vmatpush1.msra.mxu1 %v4877_v23  ;;  %v1865_v23 = vand.u32 4294901760, %v1864_v36 }
  0x65   :  { %1744 = vmatprep.subr.mxu0 %v5002_v56  ;;  %1705 = vmatmul.mubr.f32.vlgmr.msra.gmra.mxu1 %v4574_v26 }
  0x66   :  { %1824 = vmatprep.subr.mxu1 %v1823_v57  ;;  %1746 = vmatpush1.msra.mxu0 %v5013_v61 }
  0x67   :  { %1830 = vmatpush1.msra.mxu1 %v1829_v60  ;;  %1748 = vmatprep.subr.mxu0 %v5021_v5 }
  0x68   :  { %1836 = vmatprep.subr.mxu1 %v1835_v4  ;;  %1750 = vmatpush1.msra.mxu0 %v5029_v22 }
  0x69   :  { %1842 = vmatpush1.msra.mxu1 %v1841_v8  ;;  %1783 = vmatprep.mubr.f32.mxu0 %v4480_v3 }
  0x6a   :  { %1848 = vmatprep.subr.mxu1 %v1847_v14  ;;  %1933 = vmatprep.subr.mxu0 %v5000_v53  ;;  %v5301_v14 = vand.u32 4294901760, %v2283_v28 }
  0x6b   :  { %1854 = vmatpush1.msra.mxu1 %v1853_v15  ;;  %1789 = vmatmul.mubr.f32.vlgmr.msra.gmra.mxu0 %v4630_v52  ;;  %v2273_v52 = vld [vmem:[%s6462_s3 + $0x78] sm:$0xff]  ;;  %v5303_v15 = vand.u32 4294901760, %v2267_v2 }
  0x6c   :  { %1860 = vmatprep.subr.mxu1 %v1859_v37  ;;  %1936 = vmatpush1.msra.mxu0 %v5011_v59  ;;  %v5167_v21 = vand.u32 4294901760, %v2273_v52  ;;  %v2282_v37 = vld [vmem:[%s6462_s3 + $0xc0] sm:$0xff] }
  0x6d   :  { %1866 = vmatpush1.msra.mxu1 %v1865_v23  ;;  %1899 = vmatprep.mubr.f32.mxu1 %v4480_v3  ;;  %v2266_v23 = vld [vmem:[%s6462_s3 + $0x40] sm:$0xff] }
  0x6e   :  { %1939 = vmatprep.subr.mxu0 %v5019_v62  ;;  %2021 = vmatprep.subr.mxu1 %v4970_v44  ;;  %v5182_v38 = vsub.f32 %v2273_v52, %v5167_v21  ;;  %v6477_v62 = vand.u32 4294901760, %v5218_v47 }
  0x6f   :  { %1901 = vmatmul.mubr.f32.vlgmr.msra.gmra.mxu1 %v4574_v26  ;;  %1942 = vmatpush1.msra.mxu0 %v5027_v1 }
  0x70   :  { %2023 = vmatpush1.msra.mxu1 %v4977_v46  ;;  %1945 = vmatprep.subr.mxu0 %v5036_v24  ;;  %v6483_v17 = vand.u32 4294901760, %v5182_v38 }
  0x71   :  { %2025 = vmatprep.subr.mxu1 %v4984_v48  ;;  %1948 = vmatpush1.msra.mxu0 %v5042_v31 }
  0x72   :  { %2027 = vmatpush1.msra.mxu1 %v4991_v50  ;;  %1951 = vmatprep.subr.mxu0 %v5049_v63  ;;  %v2445_v49 = vsub.f32 %v5182_v38, %v6483_v17  ;;  %v2459_v63 = vsub.f32 %v5218_v47, %v6477_v62  ;;  %v2261_v62 = vld [vmem:[%s6462_s3 + $0x18] sm:$0xff] }
  0x73   :  { %2029 = vmatprep.subr.mxu1 %v5002_v56  ;;  %1954 = vmatpush1.msra.mxu0 %v5056_v32  ;;  %v2268_v32 = vld [vmem:[%s6462_s3 + $0x50] sm:$0xff] }
  0x74   :  { %2031 = vmatpush1.msra.mxu1 %v5013_v61  ;;  %1987 = vmatprep.mubr.f32.mxu0 %v4480_v3  ;;  %v2446_v1 = vand.u32 4294901760, %v2445_v49  ;;  %v2460_v55 = vand.u32 4294901760, %v2459_v63  ;;  %v5294_v7 = vand.u32 4294901760, %v2268_v32 }
  0x75   :  { %2033 = vmatprep.subr.mxu1 %v5021_v5  ;;  %2105 = vmatprep.subr.mxu0 %v1821_v9  ;;  %v5248_v9 = vsub.f32 %v2286_v18, %v5228_v51  ;;  %v5322_v18 = vsub.f32 %v2283_v28, %v5301_v14  ;;  %v2280_v28 = vld [vmem:[%s6462_s3 + $0xb0] sm:$0xff] }
  0x76   :  { %1990 = vmatmul.mubr.f32.vlgmr.msra.gmra.mxu0 %v4594_v34  ;;  %2035 = vmatpush1.msra.mxu1 %v5029_v22  ;;  %v2289_v34 = vld [vmem:[%s6462_s3 + $0xf8] sm:$0xff]  ;;  %v5314_v19 = vsub.f32 %v2268_v32, %v5294_v7 }
  0x77   :  { %2109 = vmatpush1.msra.mxu0 %v1827_v20  ;;  %2068 = vmatprep.mubr.f32.mxu1 %v4480_v3  ;;  %v2284_v20 = vld [vmem:[%s6462_s3 + $0xd0] sm:$0xff]  ;;  %6636 = vst [vmem:[#allocation5_spill] sm:$0xff] %v5322_v18 }
  0x78   :  { %2113 = vmatprep.subr.mxu0 %v1833_v27  ;;  %2199 = vmatprep.subr.mxu1 %v4970_v44  ;;  %v5279_v57 = vand.u32 4294901760, %v2284_v20  ;;  %6635 = vst [vmem:[#allocation4_spill] sm:$0xff] %v5314_v19  ;;  %v6469_v49 = vand.u32 4294901760, %v5314_v19 }
  0x79   :  { %2072 = vmatmul.mubr.f32.vlgmr.msra.gmra.mxu1 %v4611_v41  ;;  %2117 = vmatpush1.msra.mxu0 %v1839_v10  ;;  %v5162_v41 = vand.u32 4294901760, %v2289_v34 }
  0x7a   :  { %2201 = vmatpush1.msra.mxu1 %v4977_v46  ;;  %2121 = vmatprep.subr.mxu0 %v1845_v0  ;;  %v5215_v46 = vsub.f32 %v2287_v12, %v5197_v16  ;;  %v6476_v0 = vand.u32 4294901760, %v5248_v9  ;;  %v5299_v36 = vsub.f32 %v2284_v20, %v5279_v57  ;;  %v2480_v63 = vsub.f32 %v5314_v19, %v6469_v49 }
  0x7b   :  { %2203 = vmatprep.subr.mxu1 %v4984_v48  ;;  %2125 = vmatpush1.msra.mxu0 %v1851_v30  ;;  %6633 = vst [vmem:[#allocation2_spill] sm:$0xff] %v5162_v41  ;;  %v5173_v6 = vsub.f32 %v2289_v34, %v5162_v41  ;;  %v2270_v48 = vld [vmem:[%s6462_s3 + $0x60] sm:$0xff] }
  0x7c   :  { %2205 = vmatpush1.msra.mxu1 %v4991_v50  ;;  %2129 = vmatprep.subr.mxu0 %v1857_v33  ;;  %v6479_v50 = vand.u32 4294901760, %v5204_v43  ;;  %v5230_v53 = vand.u32 4294901760, %v2270_v48  ;;  %v2578_v60 = vsub.f32 %v5248_v9, %v6476_v0  ;;  %v6470_v39 = vand.u32 4294901760, %v5299_v36 }
  0x7d   :  { %2207 = vmatprep.subr.mxu1 %v5002_v56  ;;  %2133 = vmatpush1.msra.mxu0 %v1863_v35  ;;  %6634 = vst [vmem:[#allocation3_spill] sm:$0xff] %v5173_v6  ;;  %v6484_v13 = vand.u32 4294901760, %v5173_v6  ;;  %v2285_v56 = vld [vmem:[%s6462_s3 + $0xd8] sm:$0xff] }
  0x7e   :  { %2166 = vmatprep.mubr.f32.mxu0 %v4480_v3  ;;  %2209 = vmatpush1.msra.mxu1 %v5013_v61  ;;  %v6478_v61 = vand.u32 4294901760, %v5215_v46  ;;  %v5251_v24 = vsub.f32 %v2270_v48, %v5230_v53  ;;  %v5263_v10 = vand.u32 4294901760, %v2285_v56  ;;  %v2579_v34 = vand.u32 4294901760, %v2578_v60 }
  0x7f   :  { %2168 = vmatmul.mubr.f32.vlgmr.msra.gmra.mxu0 %v4574_v26  ;;  %2211 = vmatprep.subr.mxu1 %v5021_v5  ;;  %v2557_v44 = vsub.f32 %v5173_v6, %v6484_v13  ;;  %v2269_v5 = vld [vmem:[%s6462_s3 + $0x58] sm:$0xff]  ;;  %v5479_v13 = vand.u32 4294901760, %v2261_v62 }
  0x80   :  { %2246 = vmatprep.mubr.f32.mxu1 %v4480_v3  ;;  %2213 = vmatpush1.msra.mxu1 %v5029_v22  ;;  %v2288_v3 = vld [vmem:[%s6462_s3 + $0xf0] sm:$0xff]  ;;  %v2452_v22 = vsub.f32 %v5204_v43, %v6479_v50  ;;  %v2571_v27 = vsub.f32 %v5215_v46, %v6478_v61  ;;  %v6473_v54 = vand.u32 4294901760, %v5251_v24  ;;  %v5271_v30 = vand.u32 4294901760, %v2269_v5 }
  0x81   :  { %2248 = vmatmul.mubr.f32.vlgmr.msra.gmra.mxu1 %v4574_v26  ;;  %v5175_v26 = vand.u32 4294901760, %v2288_v3  ;;  %4059 = vmatprep.subr.mxu0 %v5162_v41  ;;  %v2558_v58 = vand.u32 4294901760, %v2557_v44  ;;  %v5277_v35 = vsub.f32 %v2285_v56, %v5263_v10  ;;  %v5325_v44 = vsub.f32 %v2267_v2, %v5303_v15  ;;  %6655 = vst [vmem:[#allocation24_spill] sm:$0xff] %v5479_v13 }
  0x82   :  { %4060 = vmatpush3.msra.mxu0 %v5167_v21  ;;  %v2453_v29 = vand.u32 4294901760, %v2452_v22  ;;  %v2572_v33 = vand.u32 4294901760, %v2571_v27  ;;  %v2466_v11 = vsub.f32 %v5251_v24, %v6473_v54  ;;  %v5292_v4 = vsub.f32 %v2269_v5, %v5271_v30 }
  0x83   :  { %v5195_v40 = vsub.f32 %v2288_v3, %v5175_v26  ;;  %4061 = vmatprep.subr.mxu0 %v5175_v26  ;;  %4094 = vmatprep.subr.mxu1 %v2558_v58  ;;  %v6472_v8 = vand.u32 4294901760, %v5277_v35  ;;  %6637 = vst [vmem:[#allocation6_spill] sm:$0xff] %v5325_v44  ;;  %v5332_v56 = vand.u32 4294901760, %v2282_v37  ;;  %v5334_v58 = vand.u32 4294901760, %v2266_v23 }
  0x84   :  { %4062 = vmatpush3.msra.mxu0 %v5184_v25  ;;  %4095 = vmatpush3.msra.mxu1 %v2446_v1  ;;  %v2467_v52 = vand.u32 4294901760, %v2466_v11  ;;  %v6471_v3 = vand.u32 4294901760, %v5292_v4  ;;  %v2592_v1 = vsub.f32 %v5299_v36, %v6470_v39  ;;  %v6466_v22 = vand.u32 4294901760, %v5322_v18  ;;  %v2264_v11 = vld [vmem:[%s6462_s3 + $0x30] sm:$0xff] }
  0x85   :  { %v6481_v45 = vand.u32 4294901760, %v5195_v40  ;;  %4063 = vmatprep.subr.mxu0 %v5197_v16  ;;  %v2585_v12 = vsub.f32 %v5277_v35, %v6472_v8  ;;  %v6465_v20 = vand.u32 4294901760, %v5325_v44  ;;  %v5352_v32 = vsub.f32 %v2282_v37, %v5332_v56 }
  0x86   :  { %4064 = vmatpush3.msra.mxu0 %v5199_v42  ;;  %v2473_v48 = vsub.f32 %v5292_v4, %v6471_v3  ;;  %v2481_v37 = vand.u32 4294901760, %v2480_v63  ;;  %v5386_v63 = vand.u32 4294901760, %v2280_v28 }
  0x87   :  { %v2564_v59 = vsub.f32 %v5195_v40, %v6481_v45  ;;  %4065 = vmatprep.subr.mxu0 %v5228_v51  ;;  %v2586_v5 = vand.u32 4294901760, %v2585_v12  ;;  %6638 = vst [vmem:[#allocation7_spill] sm:$0xff] %v5352_v32  ;;  %v2487_v2 = vsub.f32 %v5325_v44, %v6465_v20  ;;  %v2279_v12 = vld [vmem:[%s6462_s3 + $0xa8] sm:$0xff] }
  0x88   :  { %4066 = vmatpush3.msra.mxu0 %v5230_v53  ;;  %v2474_v27 = vand.u32 4294901760, %v2473_v48  ;;  %v2263_v48 = vld [vmem:[%s6462_s3 + $0x28] sm:$0xff]  ;;  %6641 = vst [vmem:[#allocation10_spill] sm:$0xff] %v5386_v63 }
  0x89   :  { %v2565_v31 = vand.u32 4294901760, %v2564_v59  ;;  %4067 = vmatprep.subr.mxu0 %v5263_v10  ;;  %v2281_v59 = vld [vmem:[%s6462_s3 + $0xb8] sm:$0xff] }
  0x8a   :  { %4068 = vmatpush3.msra.mxu0 %v5271_v30  ;;  %v5367_v60 = vand.u32 4294901760, %v2281_v59 }
  0x8b   :  { %4096 = vmatprep.subr.mxu1 %v2565_v31  ;;  %4069 = vmatprep.subr.mxu0 %v5279_v57  ;;  %v2265_v31 = vld [vmem:[%s6462_s3 + $0x38] sm:$0xff] }
  0x8c   :  { %4097 = vmatpush3.msra.mxu1 %v2453_v29  ;;  %4070 = vmatpush3.msra.mxu0 %v5294_v7  ;;  %v5355_v29 = vsub.f32 %v2266_v23, %v5334_v58  ;;  %v6467_v23 = vand.u32 4294901760, %v5352_v32 }
  0x8d   :  { %4098 = vmatprep.subr.mxu1 %v2572_v33  ;;  %4071 = vmatprep.subr.mxu0 %v5301_v14  ;;  %v2593_v33 = vand.u32 4294901760, %v2592_v1  ;;  %v2488_v1 = vand.u32 4294901760, %v2487_v2  ;;  %v5403_v2 = vsub.f32 %v2280_v28, %v5386_v63 }
  0x8e   :  { %4099 = vmatpush3.msra.mxu1 %v2460_v55  ;;  %4072 = vmatpush3.msra.mxu0 %v5303_v15  ;;  %6639 = vst [vmem:[#allocation8_spill] sm:$0xff] %v5355_v29  ;;  %v2599_v55 = vsub.f32 %v5322_v18, %v6466_v22  ;;  %v2606_v20 = vsub.f32 %v5352_v32, %v6467_v23  ;;  %v5407_v23 = vand.u32 4294901760, %v2263_v48 }
  0x8f   :  { %4100 = vmatprep.subr.mxu1 %v2579_v34  ;;  %4073 = vmatprep.subr.mxu0 %v5332_v56  ;;  %v6468_v34 = vand.u32 4294901760, %v5355_v29  ;;  %6644 = vst [vmem:[#allocation13_spill] sm:$0xff] %v5403_v2  ;;  %v6480_v8 = vand.u32 4294901760, %v5403_v2 }
  0x90   :  { %4101 = vmatpush3.msra.mxu1 %v2467_v52  ;;  %4074 = vmatpush3.msra.mxu0 %v5334_v58  ;;  %v5375_v52 = vand.u32 4294901760, %v2265_v31  ;;  %6646 = vst [vmem:[#allocation15_spill] sm:$0xff] %v5407_v23 }
  0x91   :  { %4102 = vmatprep.subr.mxu1 %v2586_v5  ;;  %v2600_v5 = vand.u32 4294901760, %v2599_v55  ;;  %4075 = vmatprep.subr.mxu0 %v5367_v60  ;;  %v2494_v22 = vsub.f32 %v5355_v29, %v6468_v34  ;;  %v5398_v55 = vand.u32 4294901760, %v2264_v11  ;;  %v2278_v34 = vld [vmem:[%s6462_s3 + $0xa0] sm:$0xff] }
  0x92   :  { %4103 = vmatpush3.msra.mxu1 %v2474_v27  ;;  %v5384_v27 = vsub.f32 %v2281_v59, %v5367_v60  ;;  %4076 = vmatpush3.msra.mxu0 %v5375_v52 }
  0x93   :  { %4104 = vmatprep.subr.mxu1 %v2593_v33  ;;  %v5396_v33 = vsub.f32 %v2265_v31, %v5375_v52  ;;  %6643 = vst [vmem:[#allocation12_spill] sm:$0xff] %v5398_v55  ;;  %v2262_v31 = vld [vmem:[%s6462_s3 + $0x20] sm:$0xff]  ;;  %4077 = vmatprep.subr.mxu0 %v5386_v63  ;;  %v2495_v49 = vand.u32 4294901760, %v2494_v22  ;;  %v5418_v39 = vsub.f32 %v2264_v11, %v5398_v55  ;;  %v5436_v11 = vand.u32 4294901760, %v2278_v34 }
  0x94   :  { %6640 = vst [vmem:[#allocation9_spill] sm:$0xff] %v5384_v27  ;;  %4105 = vmatpush3.msra.mxu1 %v2481_v37  ;;  %v6474_v59 = vand.u32 4294901760, %v5384_v27  ;;  %v5405_v37 = vand.u32 4294901760, %v2279_v12  ;;  %4078 = vmatpush3.msra.mxu0 %v5398_v55 }
  0x95   :  { %6642 = vst [vmem:[#allocation11_spill] sm:$0xff] %v5396_v33  ;;  %4106 = vmatprep.subr.mxu1 %v2600_v5  ;;  %v2607_v5 = vand.u32 4294901760, %v2606_v20  ;;  %v6475_v28 = vand.u32 4294901760, %v5396_v33  ;;  %6647 = vst [vmem:[#allocation16_spill] sm:$0xff] %v5418_v39  ;;  %v6482_v20 = vand.u32 4294901760, %v5418_v39 }
  0x96   :  { %6645 = vst [vmem:[#allocation14_spill] sm:$0xff] %v5405_v37  ;;  %4107 = vmatpush3.msra.mxu1 %v2488_v1  ;;  %v2613_v3 = vsub.f32 %v5384_v27, %v6474_v59  ;;  %v5426_v54 = vsub.f32 %v2279_v12, %v5405_v37  ;;  %v5429_v1 = vsub.f32 %v2263_v48, %v5407_v23  ;;  %6650 = vst [vmem:[#allocation19_spill] sm:$0xff] %v5436_v11  ;;  %v2277_v12 = vld [vmem:[%s6462_s3 + $0x98] sm:$0xff] }
  0x97   :  { %4079 = vmatprep.subr.mxu0 %v5405_v37  ;;  %4108 = vmatprep.subr.mxu1 %v2607_v5  ;;  %v2501_v22 = vsub.f32 %v5396_v33, %v6475_v28  ;;  %v5438_v59 = vand.u32 4294901760, %v2262_v31  ;;  %v2620_v5 = vsub.f32 %v5403_v2, %v6480_v8  ;;  %v2508_v50 = vsub.f32 %v5418_v39, %v6482_v20  ;;  %v2276_v8 = vld [vmem:[%s6462_s3 + $0x90] sm:$0xff] }
  0x98   :  { %6648 = vst [vmem:[#allocation17_spill] sm:$0xff] %v5426_v54  ;;  %6649 = vst [vmem:[#allocation18_spill] sm:$0xff] %v5429_v1  ;;  %4080 = vmatpush3.msra.mxu0 %v5407_v23  ;;  %4109 = vmatpush3.msra.mxu1 %v2495_v49  ;;  %v2614_v48 = vand.u32 4294901760, %v2613_v3  ;;  %v6486_v28 = vand.u32 4294901760, %v5426_v54  ;;  %v6485_v0 = vand.u32 4294901760, %v5429_v1  ;;  %v5456_v49 = vsub.f32 %v2278_v34, %v5436_v11 }
  0x99   :  { %6651 = vst [vmem:[#allocation20_spill] sm:$0xff] %v5438_v59  ;;  %v2502_v61 = vand.u32 4294901760, %v2501_v22  ;;  %v5459_v3 = vsub.f32 %v2262_v31, %v5438_v59  ;;  %4081 = vmatprep.subr.mxu0 %v5436_v11  ;;  %v2621_v45 = vand.u32 4294901760, %v2620_v5  ;;  %v5471_v20 = vand.u32 4294901760, %v2277_v12  ;;  %v2260_v31 = vld [vmem:[%s6462_s3 + $0x10] sm:$0xff] }
  0x9a   :  { %6652 = vst [vmem:[#allocation21_spill] sm:$0xff] %v5456_v49  ;;  %4110 = vmatprep.subr.mxu1 %v2614_v48  ;;  %v2627_v22 = vsub.f32 %v5426_v54, %v6486_v28  ;;  %v2515_v34 = vsub.f32 %v5429_v1, %v6485_v0  ;;  %4082 = vmatpush3.msra.mxu0 %v5438_v59  ;;  %v2509_v17 = vand.u32 4294901760, %v2508_v50  ;;  %v6495_v48 = vand.u32 4294901760, %v5456_v49  ;;  %v2275_v0 = vld [vmem:[%s6462_s3 + $0x88] sm:$0xff] }
  0x9b   :  { %6653 = vst [vmem:[#allocation22_spill] sm:$0xff] %v5459_v3  ;;  %6654 = vst [vmem:[#allocation23_spill] sm:$0xff] %v5471_v20  ;;  %4111 = vmatpush3.msra.mxu1 %v2502_v61  ;;  %v2259_v28 = vld [vmem:[%s6462_s3 + $0x8] sm:$0xff]  ;;  %v5488_v61 = vsub.f32 %v2277_v12, %v5471_v20  ;;  %v5490_v50 = vand.u32 4294901760, %v2276_v8  ;;  %4083 = vmatprep.subr.mxu0 %v5471_v20  ;;  %v6658_v39 = vand.u32 4294901760, %v5459_v3 }
  0x9c   :  { %4112 = vmatprep.subr.mxu1 %v2621_v45  ;;  %v2628_v1 = vand.u32 4294901760, %v2627_v22  ;;  %v2516_v54 = vand.u32 4294901760, %v2515_v34  ;;  %v2634_v5 = vsub.f32 %v5456_v49, %v6495_v48  ;;  %v5500_v45 = vsub.f32 %v2261_v62, %v5479_v13  ;;  %4084 = vmatpush3.msra.mxu0 %v5479_v13  ;;  %v2258_v62 = vld [vmem:[%s6462_s3] sm:$0xff] }
  0x9d   :  { %6656 = vst [vmem:[#allocation25_spill] sm:$0xff] %v5488_v61  ;;  %6657 = vst [vmem:[#allocation26_spill] sm:$0xff] %v5490_v50  ;;  %4113 = vmatpush3.msra.mxu1 %v2509_v17  ;;  %v2522_v2 = vsub.f32 %v5459_v3, %v6658_v39  ;;  %v5502_v22 = vand.u32 4294901760, %v2260_v31  ;;  %v5507_v17 = vsub.f32 %v2276_v8, %v5490_v50  ;;  %v5509_v34 = vand.u32 4294901760, %v2275_v0  ;;  %v2274_v39 = vld [vmem:[%s6462_s3 + $0x80] sm:$0xff] }
  0x9e   :  { %6659 = vst [vmem:[#allocation27_spill] sm:$0xff] %v5500_v45  ;;  %4114 = vmatprep.subr.mxu1 %v2628_v1  ;;  %v5511_v48 = vand.u32 4294901760, %v2259_v28  ;;  %4085 = vmatprep.subr.mxu0 %v5490_v50  ;;  %v2635_v1 = vand.u32 4294901760, %v2634_v5  ;;  %v6510_v8 = vand.u32 4294901760, %v5500_v45  ;;  %v6665_v49 = vand.u32 4294901760, %v5488_v61 }
  0x9f   :  { %6660 = vst [vmem:[#allocation28_spill] sm:$0xff] %v5502_v22  ;;  %6661 = vst [vmem:[#allocation29_spill] sm:$0xff] %v5507_v17  ;;  %4115 = vmatpush3.msra.mxu1 %v2516_v54  ;;  %v2523_v12 = vand.u32 4294901760, %v2522_v2  ;;  %v5522_v3 = vsub.f32 %v2260_v31, %v5502_v22  ;;  %4086 = vmatpush3.msra.mxu0 %v5502_v22  ;;  %v6518_v33 = vand.u32 4294901760, %v5507_v17  ;;  %v5540_v5 = vand.u32 4294901760, %v2274_v39 }
  0xa0   :  { %6662 = vst [vmem:[#allocation30_spill] sm:$0xff] %v5509_v34  ;;  %6663 = vst [vmem:[#allocation31_spill] sm:$0xff] %v5511_v48  ;;  %v2641_v13 = vsub.f32 %v5488_v61, %v6665_v49  ;;  %v5530_v20 = vsub.f32 %v2275_v0, %v5509_v34  ;;  %v5533_v54 = vsub.f32 %v2259_v28, %v5511_v48  ;;  %4087 = vmatprep.subr.mxu0 %v5509_v34 }
  0xa1   :  { %6664 = vst [vmem:[#allocation32_spill] sm:$0xff] %v5522_v3  ;;  %4116 = vmatprep.subr.mxu1 %v2635_v1  ;;  %v2529_v2 = vsub.f32 %v5500_v45, %v6510_v8  ;;  %v6515_v31 = vand.u32 4294901760, %v5522_v3  ;;  %6668 = vst [vmem:[#allocation35_spill] sm:$0xff] %v5540_v5  ;;  %v5542_v49 = vand.u32 4294901760, %v2258_v62  ;;  %4088 = vmatpush3.msra.mxu0 %v5511_v48 }
  0xa2   :  { %6666 = vst [vmem:[#allocation33_spill] sm:$0xff] %v5530_v20  ;;  %6667 = vst [vmem:[#allocation34_spill] sm:$0xff] %v5533_v54  ;;  %4117 = vmatpush3.msra.mxu1 %v2523_v12  ;;  %v2642_v0 = vand.u32 4294901760, %v2641_v13  ;;  %v2648_v28 = vsub.f32 %v5507_v17, %v6518_v33  ;;  %v6516_v1 = vand.u32 4294901760, %v5530_v20  ;;  %v6517_v61 = vand.u32 4294901760, %v5533_v54  ;;  %4089 = vmatprep.subr.mxu0 %v5540_v5 }
  0xa3   :  { %6669 = vst [vmem:[#allocation36_spill] sm:$0xff] %v5542_v49  ;;  %v2530_v34 = vand.u32 4294901760, %v2529_v2  ;;  %v2536_v8 = vsub.f32 %v5522_v3, %v6515_v31  ;;  %v5554_v45 = vsub.f32 %v2274_v39, %v5540_v5  ;;  %v5557_v48 = vsub.f32 %v2258_v62, %v5542_v49  ;;  %4090 = vmatpush3.msra.mxu0 %v5542_v49 }
  0xa4   :  { %4118 = vmatprep.subr.mxu1 %v2642_v0  ;;  %v2649_v13 = vand.u32 4294901760, %v2648_v28  ;;  %v2655_v12 = vsub.f32 %v5530_v20, %v6516_v1  ;;  %v2543_v2 = vsub.f32 %v5533_v54, %v6517_v61  ;;  %4129 = vmatprep.subr.mxu0 %v5173_v6 }
  0xa5   :  { %6670 = vst [vmem:[#allocation37_spill] sm:$0xff] %v5554_v45  ;;  %6671 = vst [vmem:[#allocation38_spill] sm:$0xff] %v5557_v48  ;;  %4119 = vmatpush3.msra.mxu1 %v2530_v34  ;;  %v2537_v39 = vand.u32 4294901760, %v2536_v8  ;;  %v6522_v31 = vand.u32 4294901760, %v5554_v45  ;;  %v6529_v62 = vand.u32 4294901760, %v5557_v48 }
  0xa6   :  { %4120 = vmatprep.subr.mxu1 %v2649_v13  ;;  %v2656_v0 = vand.u32 4294901760, %v2655_v12  ;;  %v2544_v28 = vand.u32 4294901760, %v2543_v2 }
  0xa7   :  { %4121 = vmatpush3.msra.mxu1 %v2537_v39  ;;  %v2662_v1 = vsub.f32 %v5554_v45, %v6522_v31  ;;  %v2550_v61 = vsub.f32 %v5557_v48, %v6529_v62 }
  0xa8   :  { %4122 = vmatprep.subr.mxu1 %v2656_v0 }
  0xa9   :  { %4123 = vmatpush3.msra.mxu1 %v2544_v28  ;;  %v2663_v34 = vand.u32 4294901760, %v2662_v1  ;;  %v2551_v8 = vand.u32 4294901760, %v2550_v61 }
  0xab   :  { %4124 = vmatprep.subr.mxu1 %v2663_v34 }
  0xac   :  { %4125 = vmatpush3.msra.mxu1 %v2551_v8 }
  0xad   :  { %4164 = vmatprep.subr.mxu1 %v5162_v41 }
  0xd1   :  { %v133_v13 = vpop.f32.mrf.mxu0 }
  0xd3   :  { %v135_v12 = vpop.f32.mrf.mxu0 }
  0xd5   :  { %v245_v2 = vpop.f32.mrf.mxu1 }
  0xd7   :  { %v247_v33 = vpop.f32.mrf.mxu1 }
  0xd9   :  { %v334_v39 = vpop.f32.mrf.mxu0 }
  0xdb   :  { %v336_v6 = vpop.f32.mrf.mxu0 }
  0xe0   :  { %v416_v54 = vpop.f32.mrf.mxu1 }
  0xe2   :  { %v418_v45 = vpop.f32.mrf.mxu1 }
  0xe3   :  { %v512_v31 = vpop.f32.mrf.mxu0 }
  0xe5   :  { %v514_v20 = vpop.f32.mrf.mxu0 }
  0xea   :  { %v592_v3 = vpop.f32.mrf.mxu1 }
  0xec   :  { %v594_v0 = vpop.f32.mrf.mxu1 }
  0xee   :  { %v676_v62 = vpop.f32.mrf.mxu0 }
  0xf0   :  { %v678_v28 = vpop.f32.mrf.mxu0 }
  0xf4   :  { %v788_v1 = vpop.f32.mrf.mxu1 }
  0xf5   :  { %v789_v61 = vadd.f32 %v788_v1, %v676_v62 }
  0xf6   :  { %v790_v34 = vpop.f32.mrf.mxu1 }
  0xf7   :  { %v791_v8 = vadd.f32 %v790_v34, %v678_v28  ;;  %v877_v48 = vpop.f32.mrf.mxu0 }
  0xf8   :  { %v878_v17 = vadd.f32 %v877_v48, %v789_v61 }
  0xf9   :  { %v879_v41 = vpop.f32.mrf.mxu0 }
  0xfa   :  { %v880_v49 = vadd.f32 %v879_v41, %v791_v8  ;;  %v246_v41 = vadd.f32 %v245_v2, %v133_v13 }
  0xfe   :  { %v959_v5 = vpop.f32.mrf.mxu1 }
  0xff   :  { %v960_v22 = vadd.f32 %v959_v5, %v878_v17  ;;  %v248_v5 = vadd.f32 %v247_v33, %v135_v12 }
 0x100   :  { %v961_v50 = vpop.f32.mrf.mxu1 }
 0x101   :  { %v962_v27 = vadd.f32 %v961_v50, %v880_v49  ;;  %v1055_v59 = vpop.f32.mrf.mxu0 }
 0x102   :  { %v1056_v29 = vadd.f32 %v1055_v59, %v960_v22  ;;  %v335_v59 = vadd.f32 %v334_v39, %v246_v41  ;;  %v6678_v41 = vld [vmem:[#allocation5_spill] sm:$0xff] }
 0x103   :  { %v1057_v11 = vpop.f32.mrf.mxu0 }
 0x104   :  { %v1058_v32 = vadd.f32 %v1057_v11, %v962_v27 }
 0x108   :  { %v1135_v23 = vpop.f32.mrf.mxu1 }
 0x109   :  { %v5577_v44 = vadd.f32 %v1135_v23, %v1056_v29  ;;  %v337_v29 = vadd.f32 %v336_v6, %v248_v5  ;;  %v417_v23 = vadd.f32 %v416_v54, %v335_v59  ;;  %v6681_v5 = vld [vmem:[#allocation15_spill] sm:$0xff]  ;;  %v6684_v59 = vld [vmem:[#allocation8_spill] sm:$0xff] }
 0x10a   :  { %v1137_v37 = vpop.f32.mrf.mxu1 }
 0x10b   :  { %6672 = vst [vmem:[#allocation39_spill] sm:$0xff] %v5577_v44  ;;  %v5579_v18 = vadd.f32 %v1137_v37, %v1058_v32  ;;  %v419_v37 = vadd.f32 %v418_v45, %v337_v29  ;;  %v513_v55 = vadd.f32 %v512_v31, %v417_v23  ;;  %v6688_v29 = vld [vmem:[#allocation23_spill] sm:$0xff] }
 0x10c   :  { %v1247_v62 = vpop.f32.mrf.mxu0  ;;  %v6689_v23 = vld [vmem:[#allocation11_spill] sm:$0xff] }
 0x10d   :  { %6673 = vst [vmem:[#allocation40_spill] sm:$0xff] %v5579_v18  ;;  %v515_v13 = vadd.f32 %v514_v20, %v419_v37  ;;  %v593_v2 = vadd.f32 %v592_v3, %v513_v55  ;;  %v6675_v20 = vld [vmem:[#allocation10_spill] sm:$0xff]  ;;  %v6676_v3 = vld [vmem:[#allocation4_spill] sm:$0xff] }
 0x10e   :  { %v1249_v28 = vpop.f32.mrf.mxu0  ;;  %v6692_v37 = vld [vmem:[#allocation26_spill] sm:$0xff] }
 0x112   :  { %v1359_v1 = vpop.f32.mrf.mxu1 }
 0x113   :  { %v1360_v34 = vadd.f32 %v1359_v1, %v1247_v62 }
 0x114   :  { %v1361_v48 = vpop.f32.mrf.mxu1 }
 0x115   :  { %v1448_v61 = vpop.f32.mrf.mxu0  ;;  %v1362_v50 = vadd.f32 %v1361_v48, %v1249_v28  ;;  %v595_v28 = vadd.f32 %v594_v0, %v515_v13  ;;  %v6677_v0 = vld [vmem:[#allocation12_spill] sm:$0xff] }
 0x116   :  { %v1449_v22 = vadd.f32 %v1448_v61, %v1360_v34  ;;  %v6679_v34 = vld [vmem:[#allocation14_spill] sm:$0xff]  ;;  %v6693_v13 = vld [vmem:[#allocation16_spill] sm:$0xff] }
 0x117   :  { %v1450_v49 = vpop.f32.mrf.mxu0 }
 0x118   :  { %v1451_v8 = vadd.f32 %v1450_v49, %v1362_v50  ;;  %v6682_v50 = vld [vmem:[#allocation7_spill] sm:$0xff] }
 0x119   :  { %v6683_v49 = vld [vmem:[#allocation19_spill] sm:$0xff] }
 0x11c   :  { %v1530_v17 = vpop.f32.mrf.mxu1 }
 0x11d   :  { %v1531_v32 = vadd.f32 %v1530_v17, %v1449_v22  ;;  %v6680_v17 = vld [vmem:[#allocation6_spill] sm:$0xff] }
 0x11e   :  { %v1532_v27 = vpop.f32.mrf.mxu1 }
 0x11f   :  { %v1626_v11 = vpop.f32.mrf.mxu0  ;;  %v1533_v44 = vadd.f32 %v1532_v27, %v1451_v8  ;;  %v6686_v27 = vld [vmem:[#allocation20_spill] sm:$0xff] }
 0x120   :  { %v1627_v19 = vadd.f32 %v1626_v11, %v1531_v32  ;;  %v6687_v11 = vld [vmem:[#allocation9_spill] sm:$0xff]  ;;  %v6690_v8 = vld [vmem:[#allocation24_spill] sm:$0xff] }
 0x121   :  { %v1628_v18 = vpop.f32.mrf.mxu0  ;;  %v6691_v32 = vld [vmem:[#allocation13_spill] sm:$0xff] }
 0x122   :  { %v1629_v62 = vadd.f32 %v1628_v18, %v1533_v44 }
 0x125   :  { %v1706_v63 = vpop.f32.mrf.mxu1 }
 0x126   :  { %v1707_v33 = vadd.f32 %v1706_v63, %v1627_v19 }
 0x127   :  { %v1708_v12 = vpop.f32.mrf.mxu1 }
 0x128   :  { %v2254_v39 = vmax.f32 %v593_v2, %v1707_v33  ;;  %v1709_v1 = vadd.f32 %v1708_v12, %v1629_v62  ;;  %v6695_v33 = vld [vmem:[#allocation28_spill] sm:$0xff]  ;;  %v6696_v12 = vld [vmem:[#allocation17_spill] sm:$0xff] }
 0x12a   :  { %v5581_v48 = vand.u32 4294901760, %v2254_v39  ;;  %v2255_v6 = vmax.f32 %v595_v28, %v1709_v1  ;;  %v6697_v28 = vld [vmem:[#allocation30_spill] sm:$0xff]  ;;  %v6699_v1 = vld [vmem:[#allocation31_spill] sm:$0xff] }
 0x12b   :  { %v5632_v22 = vpop.f32.mrf.mxu0 }
 0x12c   :  { %6674 = vst [vmem:[#allocation41_spill] sm:$0xff] %v5581_v48  ;;  %v5584_v54 = vsub.f32 %v2254_v39, %v5581_v48  ;;  %v5586_v45 = vand.u32 4294901760, %v2255_v6  ;;  %6685 = vst [vmem:[#allocation10_spill] sm:$0xff] %v5632_v22  ;;  %v6698_v39 = vld [vmem:[#allocation18_spill] sm:$0xff] }
 0x12d   :  { %v1792_v2 = vpop.f32.mrf.mxu0 }
 0x12e   :  { %v2433_v31 = vand.u32 4294901760, %v5584_v54  ;;  %v2426_v61 = vsub.f32 %v2255_v6, %v5586_v45  ;;  %2666 = vmatprep.mubr.f32.mxu1 %v5586_v45  ;;  %v6700_v6 = vld [vmem:[#allocation21_spill] sm:$0xff] }
 0x12f   :  { %2668 = vmatmul.mubr.f32.vlgmr.msra.gmra.mxu1 %v5581_v48  ;;  %v5642_v62 = vpop.f32.mrf.mxu1  ;;  %v6706_v48 = vld [vmem:[#allocation2_spill] sm:$0xff] }
 0x130   :  { %4165 = vmatpush3.msra.mxu1 %v5167_v21  ;;  %v2427_v19 = vand.u32 4294901760, %v2426_v61  ;;  %v2434_v18 = vsub.f32 %v5584_v54, %v2433_v31  ;;  %6694 = vst [vmem:[#allocation4_spill] sm:$0xff] %v5642_v62  ;;  %v6707_v62 = vld [vmem:[#allocation27_spill] sm:$0xff] }
 0x131   :  { %4166 = vmatprep.subr.mxu1 %v5175_v26 }
 0x132   :  { %4167 = vmatpush3.msra.mxu1 %v5184_v25  ;;  %2910 = vmatprep.mubr.f32.mxu1 %v2427_v19  ;;  %v2428_v44 = vsub.f32 %v2426_v61, %v2427_v19  ;;  %v2435_v55 = vand.u32 4294901760, %v2434_v18  ;;  %v6702_v19 = vld [vmem:[#allocation22_spill] sm:$0xff]  ;;  %v1904_v18 = vpop.f32.mrf.mxu1 }
 0x133   :  { %4168 = vmatprep.subr.mxu1 %v5197_v16  ;;  %v1905_v22 = vadd.f32 %v1904_v18, %v1792_v2  ;;  %v2305_v18 = vld [vmem:[%s6462_s3 + $0x178] sm:$0xff] }
 0x134   :  { %4169 = vmatpush3.msra.mxu1 %v5199_v42  ;;  %v2429_v63 = vand.u32 4294901760, %v2428_v44 }
 0x135   :  { %4170 = vmatprep.subr.mxu1 %v5228_v51 }
 0x136   :  { %4171 = vmatpush3.msra.mxu1 %v5230_v53  ;;  %2430 = vmatprep.mubr.f32.mxu0 %v2429_v63  ;;  %v5652_v44 = vpop.f32.mrf.mxu0  ;;  %v6704_v63 = vld [vmem:[#allocation36_spill] sm:$0xff] }
 0x137   :  { %4172 = vmatprep.subr.mxu1 %v5263_v10  ;;  %2436 = vmatmul.mubr.f32.vlgmr.msra.gmra.mxu0 %v2435_v55  ;;  %6703 = vst [vmem:[#allocation12_spill] sm:$0xff] %v5652_v44  ;;  %v6705_v55 = vld [vmem:[#allocation25_spill] sm:$0xff] }
 0x138   :  { %4130 = vmatpush3.msra.mxu0 %v5182_v38  ;;  %4173 = vmatpush3.msra.mxu1 %v5271_v30  ;;  %v2321_v44 = vld [vmem:[%s6462_s3 + $0x1f8] sm:$0xff] }
 0x139   :  { %4131 = vmatprep.subr.mxu0 %v5195_v40  ;;  %2803 = vmatprep.mubr.f32.mxu0 %v2426_v61  ;;  %v6701_v61 = vld [vmem:[#allocation35_spill] sm:$0xff]  ;;  %v5674_v2 = vand.u32 4294901760, %v2321_v44 }
 0x13a   :  { %4174 = vmatprep.subr.mxu1 %v5279_v57  ;;  %4132 = vmatpush3.msra.mxu0 %v5204_v43 }
 0x13b   :  { %4175 = vmatpush3.msra.mxu1 %v5294_v7  ;;  %4133 = vmatprep.subr.mxu0 %v5215_v46 }
 0x13c   :  { %4176 = vmatprep.subr.mxu1 %v5301_v14  ;;  %4134 = vmatpush3.msra.mxu0 %v5218_v47 }
 0x13d   :  { %4177 = vmatpush3.msra.mxu1 %v5303_v15  ;;  %4135 = vmatprep.subr.mxu0 %v5248_v9 }
 0x13e   :  { %4178 = vmatprep.subr.mxu1 %v5332_v56  ;;  %4136 = vmatpush3.msra.mxu0 %v5251_v24 }
 0x13f   :  { %4179 = vmatpush3.msra.mxu1 %v5334_v58  ;;  %4137 = vmatprep.subr.mxu0 %v5277_v35 }
 0x140   :  { %4180 = vmatprep.subr.mxu1 %v5367_v60  ;;  %4138 = vmatpush3.msra.mxu0 %v5292_v4 }
 0x141   :  { %4181 = vmatpush3.msra.mxu1 %v5375_v52  ;;  %4139 = vmatprep.subr.mxu0 %v5299_v36 }
 0x142   :  { %4182 = vmatprep.subr.mxu1 %v6675_v20  ;;  %4140 = vmatpush3.msra.mxu0 %v6676_v3 }
 0x143   :  { %4183 = vmatpush3.msra.mxu1 %v6677_v0  ;;  %4141 = vmatprep.subr.mxu0 %v6678_v41 }
 0x144   :  { %4184 = vmatprep.subr.mxu1 %v6679_v34  ;;  %4142 = vmatpush3.msra.mxu0 %v6680_v17 }
 0x145   :  { %4185 = vmatpush3.msra.mxu1 %v6681_v5  ;;  %4143 = vmatprep.subr.mxu0 %v6682_v50 }
 0x146   :  { %4186 = vmatprep.subr.mxu1 %v6683_v49  ;;  %4144 = vmatpush3.msra.mxu0 %v6684_v59 }
 0x147   :  { %4187 = vmatpush3.msra.mxu1 %v6686_v27  ;;  %4145 = vmatprep.subr.mxu0 %v6687_v11 }
 0x148   :  { %4188 = vmatprep.subr.mxu1 %v6688_v29  ;;  %4146 = vmatpush3.msra.mxu0 %v6689_v23 }
 0x149   :  { %4189 = vmatpush3.msra.mxu1 %v6690_v8  ;;  %4147 = vmatprep.subr.mxu0 %v6691_v32 }
 0x14a   :  { %4190 = vmatprep.subr.mxu1 %v6692_v37  ;;  %4148 = vmatpush3.msra.mxu0 %v6693_v13 }
 0x14b   :  { %4191 = vmatpush3.msra.mxu1 %v6695_v33  ;;  %4149 = vmatprep.subr.mxu0 %v6696_v12 }
 0x14c   :  { %4192 = vmatprep.subr.mxu1 %v6697_v28  ;;  %4150 = vmatpush3.msra.mxu0 %v6698_v39 }
 0x14d   :  { %4193 = vmatpush3.msra.mxu1 %v6699_v1  ;;  %4151 = vmatprep.subr.mxu0 %v6700_v6 }
 0x14e   :  { %4194 = vmatprep.subr.mxu1 %v6701_v61  ;;  %4152 = vmatpush3.msra.mxu0 %v6702_v19  ;;  %v6708_v19 = vld [vmem:[#allocation29_spill] sm:$0xff] }
 0x14f   :  { %4195 = vmatpush3.msra.mxu1 %v6704_v63  ;;  %4153 = vmatprep.subr.mxu0 %v6705_v55  ;;  %v1993_v63 = vpop.f32.mrf.mxu0  ;;  %v5666_v55 = vpop.f32.mrf.mxu1 }
 0x150   :  { %2914 = vmatmul.mubr.f32.vlgmr.msra.gmra.mxu1 %v2433_v31  ;;  %4234 = vmatprep.subr.mxu1 %v6706_v48  ;;  %6709 = vst [vmem:[#allocation5_spill] sm:$0xff] %v5666_v55  ;;  %v6710_v31 = vld [vmem:[#allocation32_spill] sm:$0xff]  ;;  %v6711_v48 = vld [vmem:[#allocation33_spill] sm:$0xff] }
 0x151   :  { %4154 = vmatpush3.msra.mxu0 %v6707_v62  ;;  %4235 = vmatpush3.msra.mxu1 %v5167_v21  ;;  %v6712_v21 = vld [vmem:[#allocation34_spill] sm:$0xff]  ;;  %v2075_v55 = vpop.f32.mrf.mxu1 }
 0x152   :  { %3184 = vmatprep.mubr.f32.mxu1 %v5586_v45  ;;  %4155 = vmatprep.subr.mxu0 %v6708_v19  ;;  %v1994_v19 = vadd.f32 %v1993_v63, %v1905_v22  ;;  %v2320_v22 = vld [vmem:[%s6462_s3 + $0x1f0] sm:$0xff] }
 0x153   :  { %4236 = vmatprep.subr.mxu1 %v5175_v26  ;;  %4156 = vmatpush3.msra.mxu0 %v6710_v31  ;;  %v6713_v26 = vld [vmem:[#allocation37_spill] sm:$0xff]  ;;  %v5681_v31 = vpop.f32.mrf.mxu0 }
 0x154   :  { %4237 = vmatpush3.msra.mxu1 %v5184_v25  ;;  %4157 = vmatprep.subr.mxu0 %v6711_v48  ;;  %6714 = vst [vmem:[#allocation14_spill] sm:$0xff] %v5681_v31  ;;  %v6715_v25 = vld [vmem:[#allocation38_spill] sm:$0xff]  ;;  %v5696_v31 = vsub.f32 %v2321_v44, %v5674_v2  ;;  %v5709_v44 = vand.u32 4294901760, %v2320_v22 }
 0x155   :  { %4238 = vmatprep.subr.mxu1 %v5197_v16  ;;  %4158 = vmatpush3.msra.mxu0 %v6712_v21  ;;  %v5687_v16 = vand.u32 4294901760, %v2305_v18 }
 0x156   :  { %4239 = vmatpush3.msra.mxu1 %v5199_v42  ;;  %4159 = vmatprep.subr.mxu0 %v6713_v26  ;;  %v6716_v42 = vld [vmem:[#allocation3_spill] sm:$0xff]  ;;  %6718 = vst [vmem:[#allocation6_spill] sm:$0xff] %v5696_v31  ;;  %v5704_v26 = vpop.f32.mrf.mxu1 }
 0x157   :  { %4240 = vmatprep.subr.mxu1 %v5228_v51  ;;  %4160 = vmatpush3.msra.mxu0 %v6715_v25  ;;  %v6717_v63 = vand.u32 4294901760, %v6716_v42  ;;  %v2076_v51 = vadd.f32 %v2075_v55, %v1994_v19  ;;  %v6719_v25 = vand.u32 4294901760, %v5182_v38  ;;  %v2319_v38 = vld [vmem:[%s6462_s3 + $0x1e8] sm:$0xff]  ;;  %v5718_v19 = vsub.f32 %v2305_v18, %v5687_v16 }
 0x158   :  { %4241 = vmatpush3.msra.mxu1 %v5230_v53  ;;  %2806 = vmatmul.mubr.f32.vlgmr.msra.gmra.mxu0 %v5584_v54  ;;  %v2304_v53 = vld [vmem:[%s6462_s3 + $0x170] sm:$0xff]  ;;  %v2171_v54 = vpop.f32.mrf.mxu0  ;;  %v6570_v55 = vand.u32 4294901760, %v5696_v31  ;;  %v6724_v18 = vand.u32 4294901760, %v5218_v47  ;;  %v5735_v42 = vand.u32 4294901760, %v2319_v38  ;;  %v2317_v47 = vld [vmem:[%s6462_s3 + $0x1d8] sm:$0xff] }
 0x159   :  { %4199 = vmatprep.subr.mxu0 %v6717_v63  ;;  %4242 = vmatprep.subr.mxu1 %v5263_v10  ;;  %v6720_v10 = vand.u32 4294901760, %v5195_v40  ;;  %6722 = vst [vmem:[#allocation15_spill] sm:$0xff] %v5718_v19  ;;  %v6723_v40 = vand.u32 4294901760, %v5215_v46  ;;  %v2302_v46 = vld [vmem:[%s6462_s3 + $0x160] sm:$0xff]  ;;  %v6725_v63 = vand.u32 4294901760, %v5248_v9  ;;  %v2301_v9 = vld [vmem:[%s6462_s3 + $0x158] sm:$0xff] }
 0x15a   :  { %4200 = vmatpush3.msra.mxu0 %v6719_v25  ;;  %3080 = vmatprep.mubr.f32.mxu0 %v5586_v45  ;;  %v6721_v45 = vand.u32 4294901760, %v5204_v43  ;;  %v5727_v25 = vand.u32 4294901760, %v2304_v53  ;;  %v2318_v43 = vld [vmem:[%s6462_s3 + $0x1e0] sm:$0xff] }
 0x15b   :  { %4243 = vmatpush3.msra.mxu1 %v5271_v30  ;;  %4201 = vmatprep.subr.mxu0 %v6720_v10  ;;  %v2303_v30 = vld [vmem:[%s6462_s3 + $0x168] sm:$0xff]  ;;  %v5744_v10 = vsub.f32 %v2320_v22, %v5709_v44  ;;  %v6728_v22 = vand.u32 4294901760, %v5277_v35  ;;  %v6730_v35 = vand.u32 4294901760, %v5292_v4  ;;  %v5794_v4 = vand.u32 4294901760, %v2301_v9 }
 0x15c   :  { %4244 = vmatprep.subr.mxu1 %v5279_v57  ;;  %4202 = vmatpush3.msra.mxu0 %v6721_v45  ;;  %v2172_v57 = vadd.f32 %v2171_v54, %v2076_v51  ;;  %v5746_v51 = vand.u32 4294901760, %v2303_v30  ;;  %v6569_v54 = vand.u32 4294901760, %v5718_v19  ;;  %v5771_v45 = vand.u32 4294901760, %v2302_v46 }
 0x15d   :  { %4245 = vmatpush3.msra.mxu1 %v5294_v7  ;;  %4203 = vmatprep.subr.mxu0 %v6723_v40  ;;  %v2251_v7 = vpop.f32.mrf.mxu1  ;;  %6726 = vst [vmem:[#allocation7_spill] sm:$0xff] %v5744_v10  ;;  %v2316_v40 = vld [vmem:[%s6462_s3 + $0x1d0] sm:$0xff] }
 0x15e   :  { %4246 = vmatprep.subr.mxu1 %v5301_v14  ;;  %4204 = vmatpush3.msra.mxu0 %v6724_v18  ;;  %v6727_v14 = vand.u32 4294901760, %v5251_v24  ;;  %v5769_v24 = vsub.f32 %v2304_v53, %v5727_v25  ;;  %v2252_v18 = vadd.f32 %v2251_v7, %v2172_v57  ;;  %v2300_v53 = vld [vmem:[%s6462_s3 + $0x150] sm:$0xff]  ;;  %v6571_v57 = vand.u32 4294901760, %v5744_v10 }
 0x15f   :  { %4247 = vmatpush3.msra.mxu1 %v5303_v15  ;;  %4205 = vmatprep.subr.mxu0 %v6725_v63  ;;  %v5755_v15 = vand.u32 4294901760, %v2318_v43  ;;  %v5782_v63 = vand.u32 4294901760, %v2317_v47  ;;  %v6734_v7 = vand.u32 4294901760, %v6676_v3  ;;  %v2298_v3 = vld [vmem:[%s6462_s3 + $0x140] sm:$0xff] }
 0x160   :  { %4248 = vmatprep.subr.mxu1 %v5332_v56  ;;  %4206 = vmatpush3.msra.mxu0 %v6727_v14  ;;  %v5766_v56 = vsub.f32 %v5696_v31, %v6570_v55  ;;  %6729 = vst [vmem:[#allocation19_spill] sm:$0xff] %v5769_v24  ;;  %v6732_v14 = vand.u32 4294901760, %v5299_v36  ;;  %v5805_v36 = vsub.f32 %v5718_v19, %v6569_v54  ;;  %v6738_v54 = vld [vmem:[#allocation40_spill] sm:$0xff] }
 0x161   :  { %4249 = vmatpush3.msra.mxu1 %v5334_v58  ;;  %4207 = vmatprep.subr.mxu0 %v6728_v22  ;;  %v5780_v58 = vsub.f32 %v2319_v38, %v5735_v42  ;;  %v2315_v38 = vld [vmem:[%s6462_s3 + $0x1c8] sm:$0xff]  ;;  %v2257_v55 = vmax.f32 %v6738_v54, %v2252_v18  ;;  %v6741_v54 = vand.u32 4294901760, %v6682_v50 }
 0x162   :  { %4250 = vmatprep.subr.mxu1 %v5367_v60  ;;  %4208 = vmatpush3.msra.mxu0 %v6730_v35  ;;  %v5792_v60 = vsub.f32 %v2303_v30, %v5746_v51  ;;  %v5810_v30 = vand.u32 4294901760, %v2316_v40  ;;  %v2299_v22 = vld [vmem:[%s6462_s3 + $0x148] sm:$0xff]  ;;  %v6572_v35 = vand.u32 4294901760, %v5769_v24 }
 0x163   :  { %6731 = vst [vmem:[#allocation8_spill] sm:$0xff] %v5780_v58  ;;  %4251 = vmatpush3.msra.mxu1 %v5375_v52  ;;  %4209 = vmatprep.subr.mxu0 %v6732_v14  ;;  %v5808_v52 = vsub.f32 %v2318_v43, %v5755_v15  ;;  %v5821_v14 = vsub.f32 %v2302_v46, %v5771_v45  ;;  %v5823_v43 = vand.u32 4294901760, %v2300_v53  ;;  %v5836_v46 = vand.u32 4294901760, %v2315_v38 }
 0x164   :  { %6733 = vst [vmem:[#allocation20_spill] sm:$0xff] %v5792_v60  ;;  %4252 = vmatprep.subr.mxu1 %v6675_v20  ;;  %4210 = vmatpush3.msra.mxu0 %v6734_v7  ;;  %v6736_v20 = vand.u32 4294901760, %v6678_v41  ;;  %v2314_v7 = vld [vmem:[%s6462_s3 + $0x1c0] sm:$0xff]  ;;  %v6573_v41 = vand.u32 4294901760, %v5780_v58  ;;  %v5853_v18 = vand.u32 4294901760, %v2299_v22 }
 0x165   :  { %6735 = vst [vmem:[#allocation9_spill] sm:$0xff] %v5808_v52  ;;  %4253 = vmatpush3.msra.mxu1 %v6677_v0  ;;  %6737 = vst [vmem:[#allocation23_spill] sm:$0xff] %v5821_v14  ;;  %v6739_v0 = vand.u32 4294901760, %v6680_v17  ;;  %v6574_v17 = vand.u32 4294901760, %v5792_v60  ;;  %v6575_v50 = vand.u32 4294901760, %v5808_v52 }
 0x166   :  { %4211 = vmatprep.subr.mxu0 %v6736_v20  ;;  %4254 = vmatprep.subr.mxu1 %v6679_v34  ;;  %v5834_v20 = vsub.f32 %v2317_v47, %v5782_v63  ;;  %v5847_v34 = vsub.f32 %v5744_v10, %v6571_v57  ;;  %v5851_v47 = vsub.f32 %v2301_v9, %v5794_v4  ;;  %v5863_v57 = vand.u32 4294901760, %v2314_v7  ;;  %v6800_v10 = vld [vmem:[#allocation14_spill] sm:$0xff] }
 0x167   :  { %4212 = vmatpush3.msra.mxu0 %v6739_v0  ;;  %4255 = vmatpush3.msra.mxu1 %v6681_v5  ;;  %v6743_v0 = vand.u32 4294901760, %v6684_v59  ;;  %v6745_v9 = vand.u32 4294901760, %v6687_v11  ;;  %v5877_v5 = vand.u32 4294901760, %v2298_v3  ;;  %v6748_v11 = vand.u32 4294901760, %v6689_v23 }
 0x168   :  { %6740 = vst [vmem:[#allocation11_spill] sm:$0xff] %v5834_v20  ;;  %4213 = vmatprep.subr.mxu0 %v6741_v54  ;;  %6742 = vst [vmem:[#allocation24_spill] sm:$0xff] %v5851_v47  ;;  %4256 = vmatprep.subr.mxu1 %v6683_v49  ;;  %v5861_v54 = vsub.f32 %v2316_v40, %v5810_v30  ;;  %v5871_v49 = vsub.f32 %v5769_v24, %v6572_v35  ;;  %v2313_v40 = vld [vmem:[%s6462_s3 + $0x1b8] sm:$0xff]  ;;  %v6750_v59 = vand.u32 4294901760, %v6691_v32 }
 0x169   :  { %4214 = vmatpush3.msra.mxu0 %v6743_v0  ;;  %4257 = vmatpush3.msra.mxu1 %v6686_v27  ;;  %v5875_v0 = vsub.f32 %v2300_v53, %v5823_v43  ;;  %v5882_v27 = vand.u32 4294901760, %v2257_v55  ;;  %v6576_v53 = vand.u32 4294901760, %v5834_v20  ;;  %v5894_v35 = vsub.f32 %v2315_v38, %v5836_v46 }
 0x16a   :  { %6744 = vst [vmem:[#allocation13_spill] sm:$0xff] %v5861_v54  ;;  %4215 = vmatprep.subr.mxu0 %v6745_v9  ;;  %4258 = vmatprep.subr.mxu1 %v6688_v29  ;;  %v5890_v9 = vsub.f32 %v5780_v58, %v6573_v41  ;;  %v5903_v23 = vsub.f32 %v5792_v60, %v6574_v17  ;;  %v6752_v38 = vand.u32 4294901760, %v6693_v13  ;;  %v5921_v17 = vand.u32 4294901760, %v2313_v40  ;;  %v6794_v58 = vld [vmem:[#allocation5_spill] sm:$0xff] }
 0x16b   :  { %6746 = vst [vmem:[#allocation26_spill] sm:$0xff] %v5875_v0  ;;  %6747 = vst [vmem:[#allocation16_spill] sm:$0xff] %v5882_v27  ;;  %4216 = vmatpush3.msra.mxu0 %v6748_v11  ;;  %4259 = vmatpush3.msra.mxu1 %v6690_v8  ;;  %v6577_v11 = vand.u32 4294901760, %v5851_v47  ;;  %v5907_v41 = vsub.f32 %v2299_v22, %v5853_v18  ;;  %v5915_v8 = vsub.f32 %v5808_v52, %v6575_v50  ;;  %v2297_v22 = vld [vmem:[%s6462_s3 + $0x138] sm:$0xff] }
 0x16c   :  { %6749 = vst [vmem:[#allocation28_spill] sm:$0xff] %v5894_v35  ;;  %4217 = vmatprep.subr.mxu0 %v6750_v59  ;;  %4260 = vmatprep.subr.mxu1 %v6692_v37  ;;  %v5919_v59 = vsub.f32 %v2314_v7, %v5863_v57  ;;  %v6754_v37 = vand.u32 4294901760, %v6696_v12  ;;  %v3315_v13 = vand.u32 4294901760, %v5871_v49  ;;  %v6582_v7 = vand.u32 4294901760, %v5875_v0 }
 0x16d   :  { %6751 = vst [vmem:[#allocation17_spill] sm:$0xff] %v5907_v41  ;;  %4218 = vmatpush3.msra.mxu0 %v6752_v38  ;;  %4261 = vmatpush3.msra.mxu1 %v6695_v33  ;;  %v6755_v38 = vand.u32 4294901760, %v5821_v14  ;;  %v5937_v29 = vsub.f32 %v2298_v3, %v5877_v5  ;;  %v5940_v32 = vsub.f32 %v2257_v55, %v5882_v27  ;;  %v6757_v33 = vand.u32 4294901760, %v6698_v39  ;;  %v2312_v3 = vld [vmem:[%s6462_s3 + $0x1b0] sm:$0xff] }
 0x16e   :  { %6753 = vst [vmem:[#allocation30_spill] sm:$0xff] %v5919_v59  ;;  %4219 = vmatprep.subr.mxu0 %v6754_v37  ;;  %4262 = vmatprep.subr.mxu1 %v6697_v28  ;;  %v3434_v12 = vand.u32 4294901760, %v5890_v9  ;;  %v5949_v49 = vsub.f32 %v5834_v20, %v6576_v53  ;;  %v6758_v28 = vand.u32 4294901760, %v6700_v6  ;;  %v3322_v39 = vand.u32 4294901760, %v5903_v23  ;;  %v2296_v9 = vld [vmem:[%s6462_s3 + $0x130] sm:$0xff]  ;;  %v2311_v37 = vld [vmem:[%s6462_s3 + $0x1a8] sm:$0xff] }
 0x16f   :  { %v5933_v50 = vsub.f32 %v5821_v14, %v6755_v38  ;;  %6756 = vst [vmem:[#allocation18_spill] sm:$0xff] %v5937_v29  ;;  %4220 = vmatpush3.msra.mxu0 %v6757_v33  ;;  %4263 = vmatpush3.msra.mxu1 %v6699_v1  ;;  %v5962_v55 = vsub.f32 %v5851_v47, %v6577_v11  ;;  %v5965_v38 = vand.u32 4294901760, %v2297_v22  ;;  %v6759_v33 = vld [vmem:[#allocation22_spill] sm:$0xff]  ;;  %v3441_v1 = vand.u32 4294901760, %v5915_v8  ;;  %v2295_v20 = vld [vmem:[%s6462_s3 + $0x128] sm:$0xff] }
 0x170   :  { %4221 = vmatprep.subr.mxu0 %v6758_v28  ;;  %4264 = vmatprep.subr.mxu1 %v6701_v61  ;;  %v6760_v53 = vand.u32 4294901760, %v6759_v33  ;;  %v6761_v6 = vand.u32 4294901760, %v5861_v54  ;;  %v5978_v11 = vsub.f32 %v2313_v40, %v5921_v17  ;;  %v6763_v61 = vld [vmem:[#allocation36_spill] sm:$0xff]  ;;  %v6764_v33 = vld [vmem:[#allocation25_spill] sm:$0xff]  ;;  %v5993_v40 = vand.u32 4294901760, %v2312_v3 }
 0x171   :  { %4265 = vmatpush3.msra.mxu1 %v6763_v61  ;;  %v3329_v8 = vand.u32 4294901760, %v5933_v50  ;;  %v6767_v61 = vld [vmem:[#allocation4_spill] sm:$0xff]  ;;  %v6769_v50 = vand.u32 4294901760, %v5766_v56  ;;  %v6770_v28 = vand.u32 4294901760, %v5894_v35  ;;  %v6777_v56 = vand.u32 4294901760, %v5919_v59 }
 0x172   :  { %4222 = vmatpush3.msra.mxu0 %v6760_v53  ;;  %v5974_v23 = vsub.f32 %v5861_v54, %v6761_v6  ;;  %6762 = vst [vmem:[#allocation31_spill] sm:$0xff] %v5978_v11  ;;  %v6765_v53 = vand.u32 4294901760, %v6764_v33  ;;  %v5990_v6 = vsub.f32 %v5875_v0, %v6582_v7  ;;  %v6766_v54 = vld [vmem:[#allocation10_spill] sm:$0xff]  ;;  %v6768_v33 = vld [vmem:[#allocation41_spill] sm:$0xff]  ;;  %v6026_v7 = vand.u32 4294901760, %v2296_v9 }
 0x173   :  { %v1903_v47 = vadd.f32 %v6767_v61, %v6766_v54  ;;  %3186 = vmatmul.mubr.f32.vlgmr.msra.gmra.mxu1 %v6768_v33  ;;  %4304 = vmatprep.subr.mxu1 %v6769_v50  ;;  %v6008_v0 = vsub.f32 %v5894_v35, %v6770_v28  ;;  %v6771_v54 = vand.u32 4294901760, %v6707_v62  ;;  %v6772_v61 = vand.u32 4294901760, %v5805_v36  ;;  %v2310_v62 = vld [vmem:[%s6462_s3 + $0x1a0] sm:$0xff]  ;;  %v6775_v36 = vld [vmem:[#allocation29_spill] sm:$0xff] }
 0x174   :  { %4223 = vmatprep.subr.mxu0 %v6765_v53  ;;  %v3448_v53 = vand.u32 4294901760, %v5949_v49  ;;  %v6773_v49 = vand.u32 4294901760, %v5907_v41  ;;  %v6024_v28 = vsub.f32 %v2297_v22, %v5965_v38  ;;  %3528 = vmatprep.mubr.f32.mxu1 %v5882_v27  ;;  %v2294_v35 = vld [vmem:[%s6462_s3 + $0x120] sm:$0xff]  ;;  %v6778_v27 = vand.u32 4294901760, %v5847_v34  ;;  %v2309_v34 = vld [vmem:[%s6462_s3 + $0x198] sm:$0xff] }
 0x175   :  { %4224 = vmatpush3.msra.mxu0 %v6771_v54  ;;  %4305 = vmatpush3.msra.mxu1 %v6772_v61  ;;  %v6776_v54 = vand.u32 4294901760, %v6775_v36  ;;  %v6779_v36 = vld [vmem:[#allocation32_spill] sm:$0xff]  ;;  %v6781_v14 = vand.u32 4294901760, %v5937_v29  ;;  %v6057_v22 = vsub.f32 %v2312_v3, %v5993_v40  ;;  %v3462_v61 = vand.u32 4294901760, %v6008_v0 }
 0x176   :  { %v6021_v50 = vsub.f32 %v5907_v41, %v6773_v49  ;;  %6774 = vst [vmem:[#allocation21_spill] sm:$0xff] %v6024_v28  ;;  %v6038_v49 = vsub.f32 %v5919_v59, %v6777_v56  ;;  %v6041_v41 = vand.u32 4294901760, %v2311_v37  ;;  %4306 = vmatprep.subr.mxu1 %v6778_v27  ;;  %v6059_v59 = vand.u32 4294901760, %v2295_v20  ;;  %v6784_v27 = vld [vmem:[#allocation12_spill] sm:$0xff] }
 0x177   :  { %4225 = vmatprep.subr.mxu0 %v6776_v54  ;;  %v6780_v54 = vand.u32 4294901760, %v6779_v36  ;;  %v6054_v56 = vsub.f32 %v5937_v29, %v6781_v14  ;;  %6782 = vst [vmem:[#allocation35_spill] sm:$0xff] %v6057_v22  ;;  %v1992_v52 = vadd.f32 %v6784_v27, %v1903_v47  ;;  %4307 = vmatpush3.msra.mxu1 %v3315_v13  ;;  %v6785_v36 = vand.u32 4294901760, %v6711_v48  ;;  %v2293_v29 = vld [vmem:[%s6462_s3 + $0x118] sm:$0xff]  ;;  %v2308_v0 = vld [vmem:[%s6462_s3 + $0x190] sm:$0xff] }
 0x178   :  { %6783 = vst [vmem:[#allocation2_spill] sm:$0xff] %v6059_v59  ;;  %v6071_v3 = vand.u32 4294901760, %v2310_v62  ;;  %4308 = vmatprep.subr.mxu1 %v3434_v12  ;;  %v6787_v60 = vand.u32 4294901760, %v6712_v21  ;;  %v6081_v13 = vsub.f32 %v2296_v9, %v6026_v7  ;;  %v6083_v27 = vand.u32 4294901760, %v2294_v35  ;;  %v2292_v48 = vld [vmem:[%s6462_s3 + $0x110] sm:$0xff] }
 0x179   :  { %4226 = vmatpush3.msra.mxu0 %v6780_v54  ;;  %v6786_v54 = vand.u32 4294901760, %v5940_v32  ;;  %4309 = vmatpush3.msra.mxu1 %v3322_v39  ;;  %v6097_v9 = vsub.f32 %v2311_v37, %v6041_v41  ;;  %v6099_v47 = vand.u32 4294901760, %v2309_v34  ;;  %v6792_v39 = vld [vmem:[#allocation38_spill] sm:$0xff]  ;;  %v2307_v37 = vld [vmem:[%s6462_s3 + $0x188] sm:$0xff]  ;;  %v2074_v24 = vadd.f32 %v6794_v58, %v1992_v52 }
 0x17a   :  { %4227 = vmatprep.subr.mxu0 %v6785_v36  ;;  %6788 = vst [vmem:[#allocation27_spill] sm:$0xff] %v6081_v13  ;;  %v6789_v36 = vld [vmem:[#allocation37_spill] sm:$0xff]  ;;  %4310 = vmatprep.subr.mxu1 %v3441_v1  ;;  %v6145_v52 = vand.u32 4294901760, %v2307_v37  ;;  %v6797_v21 = vand.u32 4294901760, %v5962_v55  ;;  %v6801_v31 = vand.u32 4294901760, %v5974_v23 }
 0x17b   :  { %v3290_v14 = vsub.f32 %v5940_v32, %v6786_v54  ;;  %4228 = vmatpush3.msra.mxu0 %v6787_v60  ;;  %v6790_v54 = vand.u32 4294901760, %v6789_v36  ;;  %v6791_v60 = vand.u32 4294901760, %v5978_v11  ;;  %v6793_v36 = vand.u32 4294901760, %v6792_v39  ;;  %4311 = vmatpush3.msra.mxu1 %v3329_v8 }
 0x17c   :  { %v6119_v39 = vsub.f32 %v2310_v62, %v6071_v3  ;;  %4312 = vmatprep.subr.mxu1 %v3448_v53  ;;  %v6132_v8 = vsub.f32 %v2294_v35, %v6083_v27  ;;  %v2306_v62 = vld [vmem:[%s6462_s3 + $0x180] sm:$0xff]  ;;  %v2170_v19 = vadd.f32 %v6800_v10, %v2074_v24 }
 0x17d   :  { %4229 = vmatprep.subr.mxu0 %v6790_v54  ;;  %v6094_v12 = vsub.f32 %v5978_v11, %v6791_v60  ;;  %v3357_v54 = vand.u32 4294901760, %v6054_v56  ;;  %v6109_v60 = vsub.f32 %v2295_v20, %v6059_v59  ;;  %v6111_v11 = vand.u32 4294901760, %v2293_v29  ;;  %v2291_v20 = vld [vmem:[%s6462_s3 + $0x108] sm:$0xff]  ;;  %v2290_v35 = vld [vmem:[%s6462_s3 + $0x100] sm:$0xff]  ;;  %4313 = vmatpush3.msra.mxu1 %v6797_v21 }
 0x17e   :  { %4230 = vmatpush3.msra.mxu0 %v6793_v36  ;;  %v3291_v1 = vand.u32 4294901760, %v3290_v14  ;;  %v6121_v56 = vand.u32 4294901760, %v2308_v0  ;;  %v6795_v36 = vand.u32 4294901760, %v6024_v28  ;;  %4314 = vmatprep.subr.mxu1 %v6801_v31  ;;  %v6802_v14 = vand.u32 4294901760, %v5990_v6 }
 0x17f   :  { %3082 = vmatmul.mubr.f32.vlgmr.msra.gmra.mxu0 %v6768_v33  ;;  %4269 = vmatprep.subr.mxu0 %v5674_v2  ;;  %v6134_v33 = vand.u32 4294901760, %v2292_v48  ;;  %v3476_v53 = vand.u32 4294901760, %v6094_v12  ;;  %v6182_v23 = vand.u32 4294901760, %v2290_v35  ;;  %v6804_v6 = vand.u32 4294901760, %v6097_v9 }
 0x180   :  { %v3363_v58 = vsub.f32 %v6024_v28, %v6795_v36  ;;  %4270 = vmatpush3.msra.mxu0 %v5687_v16  ;;  %3292 = vmatprep.mubr.f32.mxu0 %v3291_v1  ;;  %v6143_v36 = vsub.f32 %v2309_v34, %v6099_v47  ;;  %v6798_v1 = vand.u32 4294901760, %v6057_v22  ;;  %v6158_v34 = vsub.f32 %v2293_v29, %v6111_v11 }
 0x181   :  { %6796 = vst [vmem:[#allocation33_spill] sm:$0xff] %v6134_v33  ;;  %4271 = vmatprep.subr.mxu0 %v5709_v44  ;;  %v6160_v28 = vand.u32 4294901760, %v2291_v20  ;;  %v6168_v21 = vsub.f32 %v2308_v0, %v6121_v56  ;;  %4315 = vmatpush3.msra.mxu1 %v6802_v14  ;;  %v6803_v29 = vand.u32 4294901760, %v6081_v13  ;;  %v6180_v24 = vsub.f32 %v2292_v48, %v6134_v33 }
 0x182   :  { %v3482_v12 = vsub.f32 %v6057_v22, %v6798_v1  ;;  %4272 = vmatpush3.msra.mxu0 %v5727_v25  ;;  %v6170_v1 = vand.u32 4294901760, %v2306_v62  ;;  %4316 = vmatprep.subr.mxu1 %v3462_v61  ;;  %v3364_v0 = vand.u32 4294901760, %v3363_v58  ;;  %v3489_v14 = vsub.f32 %v6097_v9, %v6804_v6 }
 0x183   :  { %6799 = vst [vmem:[#allocation34_spill] sm:$0xff] %v6160_v28  ;;  %4273 = vmatprep.subr.mxu0 %v5735_v42  ;;  %v3370_v10 = vsub.f32 %v6081_v13, %v6803_v29  ;;  %v6621_v55 = vand.u32 4294901760, %v6143_v36  ;;  %v6190_v22 = vsub.f32 %v2307_v37, %v6145_v52  ;;  %v6805_v29 = vand.u32 4294901760, %v6021_v50 }
 0x184   :  { %4274 = vmatpush3.msra.mxu0 %v5746_v51  ;;  %v3483_v48 = vand.u32 4294901760, %v3482_v12  ;;  %v6806_v61 = vand.u32 4294901760, %v6109_v60  ;;  %v6622_v58 = vand.u32 4294901760, %v6158_v34  ;;  %v6200_v13 = vsub.f32 %v2291_v20, %v6160_v28 }
 0x185   :  { %4317 = vmatpush3.msra.mxu1 %v6805_v29  ;;  %4275 = vmatprep.subr.mxu0 %v5755_v15  ;;  %v2250_v6 = vadd.f32 %v5704_v26, %v2170_v19  ;;  %v6807_v37 = vand.u32 4294901760, %v6038_v49  ;;  %v6808_v50 = vand.u32 4294901760, %v6119_v39  ;;  %v6623_v29 = vand.u32 4294901760, %v6168_v21 }
 0x186   :  { %v3377_v31 = vsub.f32 %v6109_v60, %v6806_v61  ;;  %4276 = vmatpush3.msra.mxu0 %v5771_v45  ;;  %v6211_v61 = vsub.f32 %v2306_v62, %v6170_v1  ;;  %v3371_v20 = vand.u32 4294901760, %v3370_v10  ;;  %v6809_v26 = vand.u32 4294901760, %v6132_v8 }
 0x187   :  { %4318 = vmatprep.subr.mxu1 %v6807_v37  ;;  %v3496_v12 = vsub.f32 %v6119_v39, %v6808_v50  ;;  %4277 = vmatprep.subr.mxu0 %v5782_v63  ;;  %v6219_v37 = vsub.f32 %v2290_v35, %v6182_v23  ;;  %v3490_v50 = vand.u32 4294901760, %v3489_v14  ;;  %v6626_v62 = vand.u32 4294901760, %v6190_v22 }
 0x188   :  { %4319 = vmatpush3.msra.mxu1 %v3357_v54  ;;  %v3384_v19 = vsub.f32 %v6132_v8, %v6809_v26  ;;  %4278 = vmatpush3.msra.mxu0 %v5794_v4  ;;  %v3503_v54 = vsub.f32 %v6143_v36, %v6621_v55  ;;  %v3378_v10 = vand.u32 4294901760, %v3377_v31  ;;  %v3391_v26 = vsub.f32 %v6158_v34, %v6622_v58 }
 0x189   :  { %4320 = vmatprep.subr.mxu1 %v3476_v53  ;;  %4279 = vmatprep.subr.mxu0 %v5810_v30  ;;  %v6810_v53 = vld [vmem:[#allocation39_spill] sm:$0xff]  ;;  %v3497_v14 = vand.u32 4294901760, %v3496_v12  ;;  %v3510_v55 = vsub.f32 %v6168_v21, %v6623_v29  ;;  %v6811_v58 = vand.u32 4294901760, %v6180_v24  ;;  %v3517_v12 = vsub.f32 %v6190_v22, %v6626_v62 }
 0x18a   :  { %4321 = vmatpush3.msra.mxu1 %v3364_v0  ;;  %v2256_v49 = vmax.f32 %v6810_v53, %v2250_v6  ;;  %4280 = vmatpush3.msra.mxu0 %v5823_v43  ;;  %v6625_v0 = vand.u32 4294901760, %v6211_v61  ;;  %v3385_v31 = vand.u32 4294901760, %v3384_v19  ;;  %v6624_v6 = vand.u32 4294901760, %v6219_v37  ;;  %v6831_v62 = vld [vmem:[#allocation31_spill] sm:$0xff] }
 0x18b   :  { %4322 = vmatprep.subr.mxu1 %v3483_v48  ;;  %4281 = vmatprep.subr.mxu0 %v5836_v46  ;;  %v3398_v35 = vsub.f32 %v6180_v24, %v6811_v58  ;;  %v3504_v48 = vand.u32 4294901760, %v3503_v54  ;;  %v6812_v19 = vand.u32 4294901760, %v6200_v13  ;;  %v3511_v58 = vand.u32 4294901760, %v3510_v55 }
 0x18c   :  { %4323 = vmatpush3.msra.mxu1 %v3371_v20  ;;  %4282 = vmatpush3.msra.mxu0 %v5853_v18  ;;  %v3392_v20 = vand.u32 4294901760, %v3391_v26  ;;  %v6250_v29 = vand.u32 4294901760, %v2256_v49  ;;  %v3518_v26 = vand.u32 4294901760, %v3517_v12 }
 0x18d   :  { %4324 = vmatprep.subr.mxu1 %v3490_v50  ;;  %4283 = vmatprep.subr.mxu0 %v5863_v57  ;;  %v3405_v53 = vsub.f32 %v6200_v13, %v6812_v19  ;;  %v3524_v50 = vsub.f32 %v6211_v61, %v6625_v0  ;;  %v3399_v54 = vand.u32 4294901760, %v3398_v35  ;;  %v6815_v19 = vld [vmem:[#allocation6_spill] sm:$0xff] }
 0x18e   :  { %4325 = vmatpush3.msra.mxu1 %v3378_v10  ;;  %6813 = vst [vmem:[#allocation3_spill] sm:$0xff] %v6250_v29  ;;  %4284 = vmatpush3.msra.mxu0 %v5877_v5  ;;  %v3412_v10 = vsub.f32 %v6219_v37, %v6624_v6  ;;  %v6829_v6 = vld [vmem:[#allocation30_spill] sm:$0xff] }
 0x18f   :  { %4326 = vmatprep.subr.mxu1 %v3497_v14  ;;  %4285 = vmatprep.subr.mxu0 %v5921_v17  ;;  %v3406_v55 = vand.u32 4294901760, %v3405_v53  ;;  %v6263_v14 = vsub.f32 %v2256_v49, %v6250_v29  ;;  %v6814_v49 = vand.u32 4294901760, %v5940_v32  ;;  %v6816_v53 = vld [vmem:[#allocation15_spill] sm:$0xff]  ;;  %v6830_v0 = vld [vmem:[#allocation18_spill] sm:$0xff] }
 0x190   :  { %4327 = vmatpush3.msra.mxu1 %v3385_v31  ;;  %4286 = vmatpush3.msra.mxu0 %v5965_v38  ;;  %v3525_v31 = vand.u32 4294901760, %v3524_v50  ;;  %v3413_v35 = vand.u32 4294901760, %v3412_v10  ;;  %v6818_v50 = vld [vmem:[#allocation19_spill] sm:$0xff]  ;;  %v6820_v10 = vld [vmem:[#allocation20_spill] sm:$0xff] }
 0x191   :  { %4328 = vmatprep.subr.mxu1 %v3504_v48  ;;  %4287 = vmatprep.subr.mxu0 %v5993_v40  ;;  %v6627_v48 = vand.u32 4294901760, %v6263_v14 }
 0x192   :  { %4329 = vmatpush3.msra.mxu1 %v3392_v20  ;;  %4288 = vmatpush3.msra.mxu0 %v6026_v7 }
 0x193   :  { %4330 = vmatprep.subr.mxu1 %v3511_v58  ;;  %4289 = vmatprep.subr.mxu0 %v6041_v41  ;;  %v3296_v12 = vsub.f32 %v6263_v14, %v6627_v48  ;;  %v6817_v58 = vld [vmem:[#allocation7_spill] sm:$0xff]  ;;  %v6832_v48 = vld [vmem:[#allocation21_spill] sm:$0xff] }
 0x194   :  { %4331 = vmatpush3.msra.mxu1 %v3399_v54  ;;  %4290 = vmatpush3.msra.mxu0 %v6059_v59  ;;  %v6819_v54 = vld [vmem:[#allocation8_spill] sm:$0xff] }
 0x195   :  { %4332 = vmatprep.subr.mxu1 %v3518_v26  ;;  %4291 = vmatprep.subr.mxu0 %v6071_v3  ;;  %v3297_v20 = vand.u32 4294901760, %v3296_v12  ;;  %v6821_v26 = vld [vmem:[#allocation9_spill] sm:$0xff]  ;;  %v6827_v12 = vld [vmem:[#allocation28_spill] sm:$0xff] }
 0x196   :  { %4333 = vmatpush3.msra.mxu1 %v3406_v55  ;;  %4292 = vmatpush3.msra.mxu0 %v6083_v27  ;;  %v6823_v55 = vld [vmem:[#allocation11_spill] sm:$0xff] }
 0x197   :  { %4334 = vmatprep.subr.mxu1 %v3525_v31  ;;  %4293 = vmatprep.subr.mxu0 %v6099_v47  ;;  %v6824_v31 = vld [vmem:[#allocation24_spill] sm:$0xff] }
 0x198   :  { %4335 = vmatpush3.msra.mxu1 %v3413_v35  ;;  %4294 = vmatpush3.msra.mxu0 %v6111_v11  ;;  %v6825_v35 = vld [vmem:[#allocation13_spill] sm:$0xff] }
 0x199   :  { %3530 = vmatmul.mubr.f32.vlgmr.msra.gmra.mxu1 %v6250_v29  ;;  %4374 = vmatprep.subr.mxu1 %v5674_v2  ;;  %v6833_v29 = vld [vmem:[#allocation35_spill] sm:$0xff] }
 0x19a   :  { %4375 = vmatpush3.msra.mxu1 %v5687_v16  ;;  %3772 = vmatprep.mubr.f32.mxu1 %v6814_v49  ;;  %v6826_v49 = vld [vmem:[#allocation26_spill] sm:$0xff] }
 0x19b   :  { %4295 = vmatprep.subr.mxu0 %v6121_v56  ;;  %4376 = vmatprep.subr.mxu1 %v5709_v44 }
 0x19c   :  { %4296 = vmatpush3.msra.mxu0 %v6134_v33  ;;  %4377 = vmatpush3.msra.mxu1 %v5727_v25 }
 0x19d   :  { %4297 = vmatprep.subr.mxu0 %v6145_v52  ;;  %4378 = vmatprep.subr.mxu1 %v5735_v42 }
 0x19e   :  { %4298 = vmatpush3.msra.mxu0 %v6160_v28  ;;  %4379 = vmatpush3.msra.mxu1 %v5746_v51 }
 0x19f   :  { %4299 = vmatprep.subr.mxu0 %v6170_v1  ;;  %4380 = vmatprep.subr.mxu1 %v5755_v15 }
 0x1a0   :  { %4300 = vmatpush3.msra.mxu0 %v6182_v23  ;;  %4381 = vmatpush3.msra.mxu1 %v5771_v45 }
 0x1a1   :  { %3298 = vmatmul.mubr.f32.vlgmr.msra.gmra.mxu0 %v3297_v20  ;;  %4339 = vmatprep.subr.mxu0 %v6815_v19  ;;  %v6828_v20 = vld [vmem:[#allocation17_spill] sm:$0xff] }
 0x1a2   :  { %4382 = vmatprep.subr.mxu1 %v5782_v63  ;;  %4340 = vmatpush3.msra.mxu0 %v6816_v53 }
 0x1a3   :  { %3665 = vmatprep.mubr.f32.mxu0 %v5940_v32  ;;  %4383 = vmatpush3.msra.mxu1 %v5794_v4  ;;  %v6822_v32 = vld [vmem:[#allocation23_spill] sm:$0xff] }
 0x1a4   :  { %4341 = vmatprep.subr.mxu0 %v6817_v58  ;;  %4384 = vmatprep.subr.mxu1 %v5810_v30 }
 0x1a5   :  { %4342 = vmatpush3.msra.mxu0 %v6818_v50  ;;  %4385 = vmatpush3.msra.mxu1 %v5823_v43 }
 0x1a6   :  { %4343 = vmatprep.subr.mxu0 %v6819_v54  ;;  %4386 = vmatprep.subr.mxu1 %v5836_v46 }
 0x1a7   :  { %4344 = vmatpush3.msra.mxu0 %v6820_v10  ;;  %4387 = vmatpush3.msra.mxu1 %v5853_v18 }
 0x1a8   :  { %4345 = vmatprep.subr.mxu0 %v6821_v26  ;;  %4388 = vmatprep.subr.mxu1 %v5863_v57 }
 0x1a9   :  { %4346 = vmatpush3.msra.mxu0 %v6822_v32  ;;  %4389 = vmatpush3.msra.mxu1 %v5877_v5 }
 0x1aa   :  { %4347 = vmatprep.subr.mxu0 %v6823_v55  ;;  %4390 = vmatprep.subr.mxu1 %v5921_v17 }
 0x1ab   :  { %4348 = vmatpush3.msra.mxu0 %v6824_v31  ;;  %4391 = vmatpush3.msra.mxu1 %v5965_v38 }
 0x1ac   :  { %4349 = vmatprep.subr.mxu0 %v6825_v35  ;;  %4392 = vmatprep.subr.mxu1 %v5993_v40 }
 0x1ad   :  { %4350 = vmatpush3.msra.mxu0 %v6826_v49  ;;  %4393 = vmatpush3.msra.mxu1 %v6026_v7 }
 0x1ae   :  { %4351 = vmatprep.subr.mxu0 %v6827_v12  ;;  %4394 = vmatprep.subr.mxu1 %v6041_v41 }
 0x1af   :  { %4352 = vmatpush3.msra.mxu0 %v6828_v20  ;;  %4395 = vmatpush3.msra.mxu1 %v6059_v59  ;;  %v6834_v59 = vld [vmem:[#allocation27_spill] sm:$0xff] }
 0x1b0   :  { %4353 = vmatprep.subr.mxu0 %v6829_v6  ;;  %4396 = vmatprep.subr.mxu1 %v6071_v3 }
 0x1b1   :  { %4354 = vmatpush3.msra.mxu0 %v6830_v0  ;;  %4397 = vmatpush3.msra.mxu1 %v6083_v27 }
 0x1b2   :  { %4355 = vmatprep.subr.mxu0 %v6831_v62  ;;  %4398 = vmatprep.subr.mxu1 %v6099_v47 }
 0x1b3   :  { %4356 = vmatpush3.msra.mxu0 %v6832_v48  ;;  %4399 = vmatpush3.msra.mxu1 %v6111_v11 }
 0x1b4   :  { %4357 = vmatprep.subr.mxu0 %v6833_v29  ;;  %4400 = vmatprep.subr.mxu1 %v6121_v56 }
 0x1b5   :  { %4358 = vmatpush3.msra.mxu0 %v6834_v59  ;;  %4401 = vmatpush3.msra.mxu1 %v6134_v33  ;;  %v6835_v33 = vand.u32 4294901760, %v6263_v14 }
 0x1b6   :  { %4359 = vmatprep.subr.mxu0 %v6097_v9  ;;  %4402 = vmatprep.subr.mxu1 %v6145_v52 }
 0x1b7   :  { %4360 = vmatpush3.msra.mxu0 %v6109_v60  ;;  %4403 = vmatpush3.msra.mxu1 %v6160_v28  ;;  %v6836_v28 = vld [vmem:[#allocation16_spill] sm:$0xff] }
 0x1b8   :  { %4361 = vmatprep.subr.mxu0 %v6119_v39  ;;  %4404 = vmatprep.subr.mxu1 %v6170_v1 }
 0x1b9   :  { %4362 = vmatpush3.msra.mxu0 %v6132_v8  ;;  %4405 = vmatpush3.msra.mxu1 %v6182_v23 }
 0x1ba   :  { %4363 = vmatprep.subr.mxu0 %v6143_v36  ;;  %3776 = vmatmul.mubr.f32.vlgmr.msra.gmra.mxu1 %v6835_v33  ;;  %v6869_v33 = vand.u32 4294901760, %v6190_v22 }
 0x1bb   :  { %4444 = vmatprep.subr.mxu1 %v5674_v2  ;;  %4364 = vmatpush3.msra.mxu0 %v6158_v34  ;;  %v6837_v2 = vand.u32 4294901760, %v6815_v19 }
 0x1bc   :  { %4445 = vmatpush3.msra.mxu1 %v5687_v16  ;;  %4046 = vmatprep.mubr.f32.mxu1 %v6836_v28  ;;  %v6838_v16 = vand.u32 4294901760, %v6816_v53 }
 0x1bd   :  { %4365 = vmatprep.subr.mxu0 %v6168_v21  ;;  %4446 = vmatprep.subr.mxu1 %v5709_v44  ;;  %v6839_v44 = vand.u32 4294901760, %v6817_v58 }
 0x1be   :  { %4366 = vmatpush3.msra.mxu0 %v6180_v24  ;;  %4447 = vmatpush3.msra.mxu1 %v5727_v25  ;;  %v6840_v25 = vand.u32 4294901760, %v6818_v50 }
 0x1bf   :  { %4367 = vmatprep.subr.mxu0 %v6190_v22  ;;  %4448 = vmatprep.subr.mxu1 %v5735_v42  ;;  %v6841_v42 = vand.u32 4294901760, %v6819_v54  ;;  %v4058_v22 = vld [vmem:[%s6463_s4] ss:$0 sm:$0xff] }
 0x1c0   :  { %4368 = vmatpush3.msra.mxu0 %v6200_v13  ;;  %4449 = vmatpush3.msra.mxu1 %v5746_v51  ;;  %v6842_v51 = vand.u32 4294901760, %v6820_v10 }
 0x1c1   :  { %4369 = vmatprep.subr.mxu0 %v6211_v61  ;;  %4450 = vmatprep.subr.mxu1 %v5755_v15  ;;  %v6843_v15 = vand.u32 4294901760, %v6821_v26 }
 0x1c2   :  { %4370 = vmatpush3.msra.mxu0 %v6219_v37  ;;  %4451 = vmatpush3.msra.mxu1 %v5771_v45  ;;  %v6844_v45 = vand.u32 4294901760, %v6822_v32 }
 0x1c3   :  { %3668 = vmatmul.mubr.f32.vlgmr.msra.gmra.mxu0 %v6263_v14  ;;  %4409 = vmatprep.subr.mxu0 %v6837_v2 }
 0x1c4   :  { %4452 = vmatprep.subr.mxu1 %v5782_v63  ;;  %4410 = vmatpush3.msra.mxu0 %v6838_v16  ;;  %v6845_v63 = vand.u32 4294901760, %v6823_v55 }
 0x1c5   :  { %3942 = vmatprep.mubr.f32.mxu0 %v6836_v28  ;;  %4453 = vmatpush3.msra.mxu1 %v5794_v4  ;;  %v6846_v4 = vand.u32 4294901760, %v6824_v31  ;;  %v6858_v28 = vld [vmem:[#allocation33_spill] sm:$0xff] }
 0x1c6   :  { %4411 = vmatprep.subr.mxu0 %v6839_v44  ;;  %4454 = vmatprep.subr.mxu1 %v5810_v30  ;;  %v6847_v30 = vand.u32 4294901760, %v6825_v35 }
 0x1c7   :  { %4412 = vmatpush3.msra.mxu0 %v6840_v25  ;;  %4455 = vmatpush3.msra.mxu1 %v5823_v43  ;;  %v6849_v43 = vand.u32 4294901760, %v6827_v12 }
 0x1c8   :  { %4413 = vmatprep.subr.mxu0 %v6841_v42  ;;  %4456 = vmatprep.subr.mxu1 %v5836_v46  ;;  %v6850_v46 = vand.u32 4294901760, %v6828_v20 }
 0x1c9   :  { %4414 = vmatpush3.msra.mxu0 %v6842_v51  ;;  %4457 = vmatpush3.msra.mxu1 %v5853_v18  ;;  %v6852_v18 = vand.u32 4294901760, %v6829_v6 }
 0x1ca   :  { %4415 = vmatprep.subr.mxu0 %v6843_v15  ;;  %4458 = vmatprep.subr.mxu1 %v5863_v57  ;;  %v6848_v57 = vand.u32 4294901760, %v6826_v49 }
 0x1cb   :  { %4416 = vmatpush3.msra.mxu0 %v6844_v45  ;;  %4459 = vmatpush3.msra.mxu1 %v5877_v5  ;;  %v6853_v5 = vand.u32 4294901760, %v6830_v0 }
 0x1cc   :  { %4417 = vmatprep.subr.mxu0 %v6845_v63  ;;  %4460 = vmatprep.subr.mxu1 %v5921_v17  ;;  %v6851_v17 = vld [vmem:[#allocation2_spill] sm:$0xff] }
 0x1cd   :  { %4418 = vmatpush3.msra.mxu0 %v6846_v4  ;;  %4461 = vmatpush3.msra.mxu1 %v5965_v38  ;;  %v6856_v38 = vand.u32 4294901760, %v6833_v29 }
 0x1ce   :  { %4419 = vmatprep.subr.mxu0 %v6847_v30  ;;  %4462 = vmatprep.subr.mxu1 %v5993_v40  ;;  %v6857_v40 = vand.u32 4294901760, %v6834_v59  ;;  %v6863_v59 = vand.u32 4294901760, %v6132_v8  ;;  %v6870_v8 = vand.u32 4294901760, %v6200_v13 }
 0x1cf   :  { %4420 = vmatpush3.msra.mxu0 %v6848_v57  ;;  %4463 = vmatpush3.msra.mxu1 %v6026_v7  ;;  %v6854_v7 = vand.u32 4294901760, %v6831_v62 }
 0x1d0   :  { %4421 = vmatprep.subr.mxu0 %v6849_v43  ;;  %4464 = vmatprep.subr.mxu1 %v6041_v41  ;;  %v6855_v41 = vand.u32 4294901760, %v6832_v48 }
 0x1d1   :  { %4422 = vmatpush3.msra.mxu0 %v6850_v46  ;;  %4465 = vmatpush3.msra.mxu1 %v6851_v17 }
 0x1d2   :  { %4423 = vmatprep.subr.mxu0 %v6852_v18  ;;  %4466 = vmatprep.subr.mxu1 %v6071_v3  ;;  %v6859_v3 = vand.u32 4294901760, %v6097_v9  ;;  %v6864_v9 = vand.u32 4294901760, %v6143_v36  ;;  %v6871_v36 = vand.u32 4294901760, %v6211_v61 }
 0x1d3   :  { %4424 = vmatpush3.msra.mxu0 %v6853_v5  ;;  %4467 = vmatpush3.msra.mxu1 %v6083_v27  ;;  %v6861_v27 = vld [vmem:[#allocation34_spill] sm:$0xff] }
 0x1d4   :  { %4425 = vmatprep.subr.mxu0 %v6854_v7  ;;  %4468 = vmatprep.subr.mxu1 %v6099_v47  ;;  %v6860_v47 = vand.u32 4294901760, %v6109_v60  ;;  %v6866_v60 = vand.u32 4294901760, %v6158_v34 }
 0x1d5   :  { %4426 = vmatpush3.msra.mxu0 %v6855_v41  ;;  %4469 = vmatpush3.msra.mxu1 %v6111_v11  ;;  %v6862_v11 = vand.u32 4294901760, %v6119_v39  ;;  %v6868_v39 = vand.u32 4294901760, %v6180_v24 }
 0x1d6   :  { %4427 = vmatprep.subr.mxu0 %v6856_v38  ;;  %4470 = vmatprep.subr.mxu1 %v6121_v56  ;;  %v6865_v56 = vld [vmem:[#allocation3_spill] sm:$0xff] }
 0x1d7   :  { %4428 = vmatpush3.msra.mxu0 %v6857_v40  ;;  %4471 = vmatpush3.msra.mxu1 %v6858_v28 }
 0x1d8   :  { %4429 = vmatprep.subr.mxu0 %v6859_v3  ;;  %4472 = vmatprep.subr.mxu1 %v6145_v52  ;;  %v6867_v52 = vand.u32 4294901760, %v6168_v21 }
 0x1d9   :  { %4430 = vmatpush3.msra.mxu0 %v6860_v47  ;;  %4473 = vmatpush3.msra.mxu1 %v6861_v27 }
 0x1da   :  { %4431 = vmatprep.subr.mxu0 %v6862_v11  ;;  %4474 = vmatprep.subr.mxu1 %v6170_v1  ;;  %v6872_v1 = vand.u32 4294901760, %v6219_v37 }
 0x1db   :  { %4432 = vmatpush3.msra.mxu0 %v6863_v59  ;;  %4475 = vmatpush3.msra.mxu1 %v6182_v23 }
 0x1dc   :  { %4433 = vmatprep.subr.mxu0 %v6864_v9  ;;  %4048 = vmatmul.mubr.f32.vlgmr.msra.gmra.mxu1 %v6865_v56 }
 0x1dd   :  { %4434 = vmatpush3.msra.mxu0 %v6866_v60 }
 0x1de   :  { %4435 = vmatprep.subr.mxu0 %v6867_v52 }
 0x1df   :  { %4436 = vmatpush3.msra.mxu0 %v6868_v39 }
 0x1e0   :  { %4437 = vmatprep.subr.mxu0 %v6869_v33 }
 0x1e1   :  { %4438 = vmatpush3.msra.mxu0 %v6870_v8 }
 0x1e2   :  { %4439 = vmatprep.subr.mxu0 %v6871_v36 }
 0x1e3   :  { %4440 = vmatpush3.msra.mxu0 %v6872_v1 }
 0x1e4   :  { %3944 = vmatmul.mubr.f32.vlgmr.msra.gmra.mxu0 %v6865_v56 }
 0x1ef   :  { %v4126_v21 = vpop.f32.mrf.mxu1 }
 0x1f1   :  { %v4127_v62 = vpop.f32.mrf.mxu1 }
 0x1f2   :  { %v4128_v14 = vadd.f32 %v4127_v62, %v4126_v21 }
 0x1f7   :  { %v4091_v34 = vpop.f32.mrf.mxu0 }
 0x1f9   :  { %v4092_v23 = vpop.f32.mrf.mxu0 }
 0x1fa   :  { %v4093_v24 = vadd.f32 %v4092_v23, %v4091_v34 }
 0x1fc   :  { %v2438_v6 = vadd.f32 %v4093_v24, %v4058_v22 }
 0x1fe   :  { %v2670_v19 = vadd.f32 %v4128_v14, %v2438_v6 }
 0x210   :  { %v4196_v13 = vpop.f32.mrf.mxu1 }
 0x212   :  { %v4197_v37 = vpop.f32.mrf.mxu1 }
 0x213   :  { %v4198_v10 = vadd.f32 %v4197_v37, %v4196_v13 }
 0x218   :  { %v4161_v29 = vpop.f32.mrf.mxu0 }
 0x21a   :  { %v4162_v0 = vpop.f32.mrf.mxu0 }
 0x21b   :  { %v4163_v48 = vadd.f32 %v4162_v0, %v4161_v29 }
 0x21d   :  { %v2808_v50 = vadd.f32 %v4163_v48, %v2670_v19 }
 0x21f   :  { %v2916_v55 = vadd.f32 %v4198_v10, %v2808_v50 }
 0x233   :  { %v4266_v53 = vpop.f32.mrf.mxu1 }
 0x235   :  { %v4267_v32 = vpop.f32.mrf.mxu1 }
 0x236   :  { %v4268_v20 = vadd.f32 %v4267_v32, %v4266_v53 }
 0x23f   :  { %v4231_v61 = vpop.f32.mrf.mxu0 }
 0x241   :  { %v4232_v58 = vpop.f32.mrf.mxu0 }
 0x242   :  { %v4233_v26 = vadd.f32 %v4232_v58, %v4231_v61 }
 0x244   :  { %v3084_v49 = vadd.f32 %v4233_v26, %v2916_v55 }
 0x246   :  { %v3188_v44 = vadd.f32 %v4268_v20, %v3084_v49 }
 0x259   :  { %v4336_v31 = vpop.f32.mrf.mxu1 }
 0x25b   :  { %v4337_v16 = vpop.f32.mrf.mxu1 }
 0x25c   :  { %v4338_v15 = vadd.f32 %v4337_v16, %v4336_v31 }
 0x261   :  { %v4301_v54 = vpop.f32.mrf.mxu0 }
 0x263   :  { %v4302_v35 = vpop.f32.mrf.mxu0 }
 0x264   :  { %v4303_v2 = vadd.f32 %v4302_v35, %v4301_v54 }
 0x266   :  { %v3300_v51 = vadd.f32 %v4303_v2, %v3188_v44 }
 0x268   :  { %v3532_v4 = vadd.f32 %v4338_v15, %v3300_v51 }
 0x27a   :  { %v4406_v25 = vpop.f32.mrf.mxu1 }
 0x27c   :  { %v4407_v63 = vpop.f32.mrf.mxu1 }
 0x27d   :  { %v4408_v46 = vadd.f32 %v4407_v63, %v4406_v25 }
 0x283   :  { %v4371_v12 = vpop.f32.mrf.mxu0 }
 0x285   :  { %v4372_v42 = vpop.f32.mrf.mxu0 }
 0x286   :  { %v4373_v45 = vadd.f32 %v4372_v42, %v4371_v12 }
 0x288   :  { %v3670_v57 = vadd.f32 %v4373_v45, %v3532_v4 }
 0x28a   :  { %v3778_v5 = vadd.f32 %v4408_v46, %v3670_v57 }
 0x29c   :  { %v4476_v30 = vpop.f32.mrf.mxu1 }
 0x29e   :  { %v4477_v17 = vpop.f32.mrf.mxu1 }
 0x29f   :  { %v4478_v41 = vadd.f32 %v4477_v17, %v4476_v30 }
 0x2a4   :  { %v4441_v43 = vpop.f32.mrf.mxu0 }
 0x2a6   :  { %v4442_v18 = vpop.f32.mrf.mxu0 }
 0x2a7   :  { %v4443_v7 = vadd.f32 %v4442_v18, %v4441_v43 }
 0x2a9   :  { %v3946_v38 = vadd.f32 %v4443_v7, %v3778_v5 }
 0x2ab   :  { %v4050_v40 = vadd.f32 %v4478_v41, %v3946_v38 }
 0x2ad   :  { %4053 = vst [vmem:[%s6464_s5] sm:$0xff] %v4050_v40 }

</bundles_post_ra>
